<compile_context>
chip_gen: v6e
topology: v6e:2x2x1
jax: 0.10.0
libtpu: 0.0.40
codegen_flags: <defaults>
</compile_context>

<pallas_src>
import functools

import jax
import jax.numpy as jnp
from jax.experimental import pallas as pl
from jax.experimental.pallas import tpu as pltpu


def _round_up(x, m):
    return ((x + m - 1) // m) * m


def _pick_tile_m(M, K, Cout, out_itemsize, vmem_budget=24 * 1024 * 1024):
    """Largest M-tile whose double-buffered in/out tiles + resident weights fit the budget."""
    def fits(tm):
        need = (2 * tm * K * 2           # double-buffered bf16 activation tile
                + K * Cout * 2           # resident bf16 weights
                + 2 * tm * Cout * out_itemsize  # double-buffered output tile
                + 4 * Cout)              # resident f32 bias
        return need <= vmem_budget

    m8 = _round_up(M, 8)
    if m8 <= 2048 and fits(m8):
        return m8                        # single-tile (or minimal-pad) case
    for tm in (2048, 1024, 512, 256, 128, 64, 32, 16, 8):
        if tm <= m8 and fits(tm):
            return tm
    return 8


def _conv_gemm_kernel(p_ref, w_ref, b_ref, o_ref, *, negative_slope, apply_act):
    # (tile_m, K) @ (K, Cout) on the MXU with f32 accumulation, fused bias + LeakyReLU.
    acc = jnp.dot(p_ref[...], w_ref[...], preferred_element_type=jnp.float32)
    acc = acc + b_ref[...]
    if apply_act:
        acc = jnp.where(acc >= 0.0, acc, negative_slope * acc)
    o_ref[...] = acc.astype(o_ref.dtype)


def _conv4x4_s2_p1(x_nhwc, w_oihw, bias, *, apply_act, negative_slope, out_dtype):
    """4x4 / stride-2 / pad-1 Conv2d (+ optional LeakyReLU) via im2col + Pallas GEMM."""
    B, H, W, Cin = x_nhwc.shape
    Cout = w_oihw.shape[0]
    assert H % 2 == 0 and W % 2 == 0, "spatial dims must be even for a stride-2 conv"
    OH, OW = H // 2, W // 2

    # Zero-pad by 1 pixel per spatial side, then gather the 16 kernel-tap slabs.
    xp = jnp.pad(x_nhwc, ((0, 0), (1, 1), (1, 1), (0, 0)))
    slabs = []
    for ky in range(4):
        for kx in range(4):
            slabs.append(xp[:, ky:ky + 2 * OH - 1:2, kx:kx + 2 * OW - 1:2, :])
    # (B, OH, OW, 16*Cin) with feature order (ky, kx, ci), ci fastest.
    patches = jnp.concatenate(slabs, axis=-1)

    K = 16 * Cin
    M = B * OH * OW
    patches = patches.reshape(M, K).astype(jnp.bfloat16)

    # PyTorch weight (Cout, Cin, 4, 4) -> (ky, kx, ci, Cout) -> (K, Cout) to match patches.
    w_gemm = jnp.transpose(w_oihw, (2, 3, 1, 0)).reshape(K, Cout).astype(jnp.bfloat16)
    b_row = bias.reshape(1, Cout).astype(jnp.float32)

    out_itemsize = jnp.dtype(out_dtype).itemsize
    tile_m = _pick_tile_m(M, K, Cout, out_itemsize)
    Mp = _round_up(M, tile_m)
    if Mp != M:
        patches = jnp.pad(patches, ((0, Mp - M), (0, 0)))

    kernel = functools.partial(
        _conv_gemm_kernel, negative_slope=negative_slope, apply_act=apply_act)

    cost = pl.CostEstimate(
        flops=2 * Mp * K * Cout,
        transcendentals=0,
        bytes_accessed=Mp * K * 2 + K * Cout * 2 + Cout * 4 + Mp * Cout * out_itemsize)

    out = pl.pallas_call(
        kernel,
        out_shape=jax.ShapeDtypeStruct((Mp, Cout), out_dtype),
        grid_spec=pltpu.PrefetchScalarGridSpec(
            num_scalar_prefetch=0,
            grid=(Mp // tile_m,),
            in_specs=[
                pl.BlockSpec((tile_m, K), lambda i: (i, 0)),   # streamed activation tiles
                pl.BlockSpec((K, Cout), lambda i: (0, 0)),     # resident weights
                pl.BlockSpec((1, Cout), lambda i: (0, 0)),     # resident bias
            ],
            out_specs=pl.BlockSpec((tile_m, Cout), lambda i: (i, 0)),
        ),
        compiler_params=pltpu.CompilerParams(
            dimension_semantics=("parallel",),
            vmem_limit_bytes=48 * 1024 * 1024,
        ),
        cost_estimate=cost,
    )(patches, w_gemm, b_row)

    return out[:M].reshape(B, OH, OW, Cout)


def fc_discriminator_pallas(x_nchw, params, negative_slope=0.2):
    """FCDiscriminator.forward: conv1..conv4 (+LeakyReLU) then classifier, NCHW in/out."""
    x = jnp.transpose(x_nchw, (0, 2, 3, 1)).astype(jnp.float32)   # NCHW -> NHWC (once)
    layer_defs = [('w1', 'b1', True), ('w2', 'b2', True), ('w3', 'b3', True),
                  ('w4', 'b4', True), ('wc', 'bc', False)]
    for wname, bname, act in layer_defs:
        x = _conv4x4_s2_p1(
            x, params[wname], params[bname],
            apply_act=act, negative_slope=negative_slope,
            out_dtype=jnp.bfloat16 if act else jnp.float32)
    return jnp.transpose(x, (0, 3, 1, 2))                         # NHWC -> NCHW (once)


# Jit the whole pipeline so the XLA-side im2col (pad + slices + concat + reshape) fuses
# per layer and the 5 pallas_calls dispatch as one executable.
fc_discriminator_pallas_jit = jax.jit(
    fc_discriminator_pallas, static_argnames=('negative_slope',))


def fc_discriminator_ref(x_nchw, params, negative_slope=0.2):
    """Pure-JAX f32 reference mirroring the PyTorch forward."""
    def conv(x, w, b):
        y = jax.lax.conv_general_dilated(
            x, w, window_strides=(2, 2), padding=((1, 1), (1, 1)),
            dimension_numbers=('NCHW', 'OIHW', 'NCHW'))
        return y + b[None, :, None, None]

    def lrelu(v):
        return jnp.where(v >= 0.0, v, negative_slope * v)

    x = lrelu(conv(x_nchw, params['w1'], params['b1']))
    x = lrelu(conv(x, params['w2'], params['b2']))
    x = lrelu(conv(x, params['w3'], params['b3']))
    x = lrelu(conv(x, params['w4'], params['b4']))
    return conv(x, params['wc'], params['bc'])


def make_params(key, num_class, ndf):
    chans = [num_class, ndf, ndf * 2, ndf * 4, ndf * 8, 1]
    names = ['1', '2', '3', '4', 'c']
    keys = jax.random.split(key, 2 * len(names))
    params = {}
    for i, name in enumerate(names):
        cin, cout = chans[i], chans[i + 1]
        fan_in = float(cin * 16)
        params['w' + name] = (jax.random.normal(keys[2 * i], (cout, cin, 4, 4), jnp.float32)
                              / jnp.sqrt(fan_in))
        params['b' + name] = 0.05 * jax.random.normal(keys[2 * i + 1], (cout,), jnp.float32)
    return params


if __name__ == "__main__":
    # 5 stride-2 convs need spatial >= 32:  32 -> 16 -> 8 -> 4 -> 2 -> 1.
    B, NUM_CLASS, H, W = 2, 4, 32, 32
    NDF = 8

    key = jax.random.PRNGKey(0)
    kx, kp = jax.random.split(key)
    x = jax.random.normal(kx, (B, NUM_CLASS, H, W), jnp.float32)
    params = make_params(kp, NUM_CLASS, NDF)

    out = jax.block_until_ready(fc_discriminator_pallas_jit(x, params))
    ref = jax.block_until_ready(fc_discriminator_ref(x, params))

    assert out.shape == (B, 1, 1, 1), out.shape
    out_f32 = out.astype(jnp.float32)
    max_err = float(jnp.max(jnp.abs(out_f32 - ref)))
    # bf16 MXU matmuls (intentional) -> loose tolerance vs f32 reference.
    assert jnp.allclose(out_f32, ref, atol=1e-1, rtol=1e-1), max_err

    print("KERNEL_OK")
</pallas_src>

<mosaic_0001>
module attributes {stable_mosaic.version = 11 : i64} {
  func.func @_conv_gemm_kernel(%arg0: i32, %arg1: memref<512x64xbf16, #tpu.memory_space<vmem>>, %arg2: memref<64x8xbf16, #tpu.memory_space<vmem>>, %arg3: memref<1x8xf32, #tpu.memory_space<vmem>>, %arg4: memref<512x8xbf16, #tpu.memory_space<vmem>>) attributes {dimension_semantics = [#tpu.dimension_semantics<parallel>], iteration_bounds = array<i64: 1>, scalar_prefetch = 0 : i64, scratch_operands = 0 : i64, tpu.core_type = #tpu.core_type<tc>, window_params = [{transform_indices = @transform_0, window_bounds = array<i64: 512, 64>}, {pipeline_mode = #tpu.pipeline_mode<synchronous>, transform_indices = @transform_1, window_bounds = array<i64: 64, 8>}, {pipeline_mode = #tpu.pipeline_mode<synchronous>, transform_indices = @transform_2, window_bounds = array<i64: 1, 8>}, {transform_indices = @transform_3, window_bounds = array<i64: 512, 8>}]} {
    %c0 = arith.constant 0 : index
    %c0_0 = arith.constant 0 : index
    %0 = vector.load %arg1[%c0, %c0_0] : memref<512x64xbf16, #tpu.memory_space<vmem>>, vector<512x64xbf16>
    %c0_1 = arith.constant 0 : index
    %c0_2 = arith.constant 0 : index
    %1 = vector.load %arg2[%c0_1, %c0_2] : memref<64x8xbf16, #tpu.memory_space<vmem>>, vector<64x8xbf16>
    %cst = arith.constant dense<0.000000e+00> : vector<512x8xf32>
    %2 = tpu.matmul %0, %1, %cst {dimension_numbers = #tpu.dot_dimension_numbers<[1], [0], [0], [1], [0, 0, 1, 1], [], []>} : vector<512x64xbf16>, vector<64x8xbf16>, vector<512x8xf32> -> vector<512x8xf32>
    %c0_3 = arith.constant 0 : index
    %c0_4 = arith.constant 0 : index
    %3 = vector.load %arg3[%c0_3, %c0_4] : memref<1x8xf32, #tpu.memory_space<vmem>>, vector<1x8xf32>
    %4 = vector.broadcast %3 : vector<1x8xf32> to vector<512x8xf32>
    %5 = arith.addf %2, %4 : vector<512x8xf32>
    %cst_5 = arith.constant 0.000000e+00 : f32
    %6 = vector.broadcast %cst_5 : f32 to vector<512x8xf32>
    %7 = arith.cmpf oge, %5, %6 : vector<512x8xf32>
    %cst_6 = arith.constant 2.000000e-01 : f32
    %8 = vector.broadcast %cst_6 : f32 to vector<512x8xf32>
    %9 = arith.mulf %8, %5 : vector<512x8xf32>
    %10 = arith.select %7, %5, %9 : vector<512x8xi1>, vector<512x8xf32>
    %11 = arith.truncf %10 : vector<512x8xf32> to vector<512x8xbf16>
    %c0_7 = arith.constant 0 : index
    %c0_8 = arith.constant 0 : index
    %12 = vector.load %arg4[%c0_7, %c0_8] : memref<512x8xbf16, #tpu.memory_space<vmem>>, vector<512x8xbf16>
    tpu.vector_store %arg4[%c0_7, %c0_8], %11 {strides = array<i32>} : memref<512x8xbf16, #tpu.memory_space<vmem>>, vector<512x8xbf16>,
    return
  }
  func.func @transform_0(%arg0: i32) -> (i32, i32) {
    %c0_i32 = arith.constant 0 : i32
    %c0_i32_0 = arith.constant 0 : i32
    return %arg0, %c0_i32 : i32, i32
  }
  func.func @transform_1(%arg0: i32) -> (i32, i32) {
    %c0_i32 = arith.constant 0 : i32
    %c0_i32_0 = arith.constant 0 : i32
    %c0_i32_1 = arith.constant 0 : i32
    return %c0_i32, %c0_i32_0 : i32, i32
  }
  func.func @transform_2(%arg0: i32) -> (i32, i32) {
    %c0_i32 = arith.constant 0 : i32
    %c0_i32_0 = arith.constant 0 : i32
    %c0_i32_1 = arith.constant 0 : i32
    return %c0_i32, %c0_i32_0 : i32, i32
  }
  func.func @transform_3(%arg0: i32) -> (i32, i32) {
    %c0_i32 = arith.constant 0 : i32
    %c0_i32_0 = arith.constant 0 : i32
    return %arg0, %c0_i32 : i32, i32
  }
}

module attributes {stable_mosaic.version = 11 : i64} {
  func.func @_conv_gemm_kernel(%arg0: i32, %arg1: memref<128x128xbf16, #tpu.memory_space<vmem>>, %arg2: memref<128x16xbf16, #tpu.memory_space<vmem>>, %arg3: memref<1x16xf32, #tpu.memory_space<vmem>>, %arg4: memref<128x16xbf16, #tpu.memory_space<vmem>>) attributes {dimension_semantics = [#tpu.dimension_semantics<parallel>], iteration_bounds = array<i64: 1>, scalar_prefetch = 0 : i64, scratch_operands = 0 : i64, tpu.core_type = #tpu.core_type<tc>, window_params = [{transform_indices = @transform_0, window_bounds = array<i64: 128, 128>}, {pipeline_mode = #tpu.pipeline_mode<synchronous>, transform_indices = @transform_1, window_bounds = array<i64: 128, 16>}, {pipeline_mode = #tpu.pipeline_mode<synchronous>, transform_indices = @transform_2, window_bounds = array<i64: 1, 16>}, {transform_indices = @transform_3, window_bounds = array<i64: 128, 16>}]} {
    %c0 = arith.constant 0 : index
    %c0_0 = arith.constant 0 : index
    %0 = vector.load %arg1[%c0, %c0_0] : memref<128x128xbf16, #tpu.memory_space<vmem>>, vector<128x128xbf16>
    %c0_1 = arith.constant 0 : index
    %c0_2 = arith.constant 0 : index
    %1 = vector.load %arg2[%c0_1, %c0_2] : memref<128x16xbf16, #tpu.memory_space<vmem>>, vector<128x16xbf16>
    %cst = arith.constant dense<0.000000e+00> : vector<128x16xf32>
    %2 = tpu.matmul %0, %1, %cst {dimension_numbers = #tpu.dot_dimension_numbers<[1], [0], [0], [1], [0, 0, 1, 1], [], []>} : vector<128x128xbf16>, vector<128x16xbf16>, vector<128x16xf32> -> vector<128x16xf32>
    %c0_3 = arith.constant 0 : index
    %c0_4 = arith.constant 0 : index
    %3 = vector.load %arg3[%c0_3, %c0_4] : memref<1x16xf32, #tpu.memory_space<vmem>>, vector<1x16xf32>
    %4 = vector.broadcast %3 : vector<1x16xf32> to vector<128x16xf32>
    %5 = arith.addf %2, %4 : vector<128x16xf32>
    %cst_5 = arith.constant 0.000000e+00 : f32
    %6 = vector.broadcast %cst_5 : f32 to vector<128x16xf32>
    %7 = arith.cmpf oge, %5, %6 : vector<128x16xf32>
    %cst_6 = arith.constant 2.000000e-01 : f32
    %8 = vector.broadcast %cst_6 : f32 to vector<128x16xf32>
    %9 = arith.mulf %8, %5 : vector<128x16xf32>
    %10 = arith.select %7, %5, %9 : vector<128x16xi1>, vector<128x16xf32>
    %11 = arith.truncf %10 : vector<128x16xf32> to vector<128x16xbf16>
    %c0_7 = arith.constant 0 : index
    %c0_8 = arith.constant 0 : index
    %12 = vector.load %arg4[%c0_7, %c0_8] : memref<128x16xbf16, #tpu.memory_space<vmem>>, vector<128x16xbf16>
    tpu.vector_store %arg4[%c0_7, %c0_8], %11 {strides = array<i32>} : memref<128x16xbf16, #tpu.memory_space<vmem>>, vector<128x16xbf16>,
    return
  }
  func.func @transform_0(%arg0: i32) -> (i32, i32) {
    %c0_i32 = arith.constant 0 : i32
    %c0_i32_0 = arith.constant 0 : i32
    return %arg0, %c0_i32 : i32, i32
  }
  func.func @transform_1(%arg0: i32) -> (i32, i32) {
    %c0_i32 = arith.constant 0 : i32
    %c0_i32_0 = arith.constant 0 : i32
    %c0_i32_1 = arith.constant 0 : i32
    return %c0_i32, %c0_i32_0 : i32, i32
  }
  func.func @transform_2(%arg0: i32) -> (i32, i32) {
    %c0_i32 = arith.constant 0 : i32
    %c0_i32_0 = arith.constant 0 : i32
    %c0_i32_1 = arith.constant 0 : i32
    return %c0_i32, %c0_i32_0 : i32, i32
  }
  func.func @transform_3(%arg0: i32) -> (i32, i32) {
    %c0_i32 = arith.constant 0 : i32
    %c0_i32_0 = arith.constant 0 : i32
    return %arg0, %c0_i32 : i32, i32
  }
}

module attributes {stable_mosaic.version = 11 : i64} {
  func.func @_conv_gemm_kernel(%arg0: i32, %arg1: memref<32x256xbf16, #tpu.memory_space<vmem>>, %arg2: memref<256x32xbf16, #tpu.memory_space<vmem>>, %arg3: memref<1x32xf32, #tpu.memory_space<vmem>>, %arg4: memref<32x32xbf16, #tpu.memory_space<vmem>>) attributes {dimension_semantics = [#tpu.dimension_semantics<parallel>], iteration_bounds = array<i64: 1>, scalar_prefetch = 0 : i64, scratch_operands = 0 : i64, tpu.core_type = #tpu.core_type<tc>, window_params = [{transform_indices = @transform_0, window_bounds = array<i64: 32, 256>}, {pipeline_mode = #tpu.pipeline_mode<synchronous>, transform_indices = @transform_1, window_bounds = array<i64: 256, 32>}, {pipeline_mode = #tpu.pipeline_mode<synchronous>, transform_indices = @transform_2, window_bounds = array<i64: 1, 32>}, {transform_indices = @transform_3, window_bounds = array<i64: 32, 32>}]} {
    %c0 = arith.constant 0 : index
    %c0_0 = arith.constant 0 : index
    %0 = vector.load %arg1[%c0, %c0_0] : memref<32x256xbf16, #tpu.memory_space<vmem>>, vector<32x256xbf16>
    %c0_1 = arith.constant 0 : index
    %c0_2 = arith.constant 0 : index
    %1 = vector.load %arg2[%c0_1, %c0_2] : memref<256x32xbf16, #tpu.memory_space<vmem>>, vector<256x32xbf16>
    %cst = arith.constant dense<0.000000e+00> : vector<32x32xf32>
    %2 = tpu.matmul %0, %1, %cst {dimension_numbers = #tpu.dot_dimension_numbers<[1], [0], [0], [1], [0, 0, 1, 1], [], []>} : vector<32x256xbf16>, vector<256x32xbf16>, vector<32x32xf32> -> vector<32x32xf32>
    %c0_3 = arith.constant 0 : index
    %c0_4 = arith.constant 0 : index
    %3 = vector.load %arg3[%c0_3, %c0_4] : memref<1x32xf32, #tpu.memory_space<vmem>>, vector<1x32xf32>
    %4 = vector.broadcast %3 : vector<1x32xf32> to vector<32x32xf32>
    %5 = arith.addf %2, %4 : vector<32x32xf32>
    %cst_5 = arith.constant 0.000000e+00 : f32
    %6 = vector.broadcast %cst_5 : f32 to vector<32x32xf32>
    %7 = arith.cmpf oge, %5, %6 : vector<32x32xf32>
    %cst_6 = arith.constant 2.000000e-01 : f32
    %8 = vector.broadcast %cst_6 : f32 to vector<32x32xf32>
    %9 = arith.mulf %8, %5 : vector<32x32xf32>
    %10 = arith.select %7, %5, %9 : vector<32x32xi1>, vector<32x32xf32>
    %11 = arith.truncf %10 : vector<32x32xf32> to vector<32x32xbf16>
    %c0_7 = arith.constant 0 : index
    %c0_8 = arith.constant 0 : index
    %12 = vector.load %arg4[%c0_7, %c0_8] : memref<32x32xbf16, #tpu.memory_space<vmem>>, vector<32x32xbf16>
    tpu.vector_store %arg4[%c0_7, %c0_8], %11 {strides = array<i32>} : memref<32x32xbf16, #tpu.memory_space<vmem>>, vector<32x32xbf16>,
    return
  }
  func.func @transform_0(%arg0: i32) -> (i32, i32) {
    %c0_i32 = arith.constant 0 : i32
    %c0_i32_0 = arith.constant 0 : i32
    return %arg0, %c0_i32 : i32, i32
  }
  func.func @transform_1(%arg0: i32) -> (i32, i32) {
    %c0_i32 = arith.constant 0 : i32
    %c0_i32_0 = arith.constant 0 : i32
    %c0_i32_1 = arith.constant 0 : i32
    return %c0_i32, %c0_i32_0 : i32, i32
  }
  func.func @transform_2(%arg0: i32) -> (i32, i32) {
    %c0_i32 = arith.constant 0 : i32
    %c0_i32_0 = arith.constant 0 : i32
    %c0_i32_1 = arith.constant 0 : i32
    return %c0_i32, %c0_i32_0 : i32, i32
  }
  func.func @transform_3(%arg0: i32) -> (i32, i32) {
    %c0_i32 = arith.constant 0 : i32
    %c0_i32_0 = arith.constant 0 : i32
    return %arg0, %c0_i32 : i32, i32
  }
}

module attributes {stable_mosaic.version = 11 : i64} {
  func.func @_conv_gemm_kernel(%arg0: i32, %arg1: memref<8x512xbf16, #tpu.memory_space<vmem>>, %arg2: memref<512x64xbf16, #tpu.memory_space<vmem>>, %arg3: memref<1x64xf32, #tpu.memory_space<vmem>>, %arg4: memref<8x64xbf16, #tpu.memory_space<vmem>>) attributes {dimension_semantics = [#tpu.dimension_semantics<parallel>], iteration_bounds = array<i64: 1>, scalar_prefetch = 0 : i64, scratch_operands = 0 : i64, tpu.core_type = #tpu.core_type<tc>, window_params = [{transform_indices = @transform_0, window_bounds = array<i64: 8, 512>}, {pipeline_mode = #tpu.pipeline_mode<synchronous>, transform_indices = @transform_1, window_bounds = array<i64: 512, 64>}, {pipeline_mode = #tpu.pipeline_mode<synchronous>, transform_indices = @transform_2, window_bounds = array<i64: 1, 64>}, {transform_indices = @transform_3, window_bounds = array<i64: 8, 64>}]} {
    %c0 = arith.constant 0 : index
    %c0_0 = arith.constant 0 : index
    %0 = vector.load %arg1[%c0, %c0_0] : memref<8x512xbf16, #tpu.memory_space<vmem>>, vector<8x512xbf16>
    %c0_1 = arith.constant 0 : index
    %c0_2 = arith.constant 0 : index
    %1 = vector.load %arg2[%c0_1, %c0_2] : memref<512x64xbf16, #tpu.memory_space<vmem>>, vector<512x64xbf16>
    %cst = arith.constant dense<0.000000e+00> : vector<8x64xf32>
    %2 = tpu.matmul %0, %1, %cst {dimension_numbers = #tpu.dot_dimension_numbers<[1], [0], [0], [1], [0, 0, 1, 1], [], []>} : vector<8x512xbf16>, vector<512x64xbf16>, vector<8x64xf32> -> vector<8x64xf32>
    %c0_3 = arith.constant 0 : index
    %c0_4 = arith.constant 0 : index
    %3 = vector.load %arg3[%c0_3, %c0_4] : memref<1x64xf32, #tpu.memory_space<vmem>>, vector<1x64xf32>
    %4 = vector.broadcast %3 : vector<1x64xf32> to vector<8x64xf32>
    %5 = arith.addf %2, %4 : vector<8x64xf32>
    %cst_5 = arith.constant 0.000000e+00 : f32
    %6 = vector.broadcast %cst_5 : f32 to vector<8x64xf32>
    %7 = arith.cmpf oge, %5, %6 : vector<8x64xf32>
    %cst_6 = arith.constant 2.000000e-01 : f32
    %8 = vector.broadcast %cst_6 : f32 to vector<8x64xf32>
    %9 = arith.mulf %8, %5 : vector<8x64xf32>
    %10 = arith.select %7, %5, %9 : vector<8x64xi1>, vector<8x64xf32>
    %11 = arith.truncf %10 : vector<8x64xf32> to vector<8x64xbf16>
    %c0_7 = arith.constant 0 : index
    %c0_8 = arith.constant 0 : index
    %12 = vector.load %arg4[%c0_7, %c0_8] : memref<8x64xbf16, #tpu.memory_space<vmem>>, vector<8x64xbf16>
    tpu.vector_store %arg4[%c0_7, %c0_8], %11 {strides = array<i32>} : memref<8x64xbf16, #tpu.memory_space<vmem>>, vector<8x64xbf16>,
    return
  }
  func.func @transform_0(%arg0: i32) -> (i32, i32) {
    %c0_i32 = arith.constant 0 : i32
    %c0_i32_0 = arith.constant 0 : i32
    return %arg0, %c0_i32 : i32, i32
  }
  func.func @transform_1(%arg0: i32) -> (i32, i32) {
    %c0_i32 = arith.constant 0 : i32
    %c0_i32_0 = arith.constant 0 : i32
    %c0_i32_1 = arith.constant 0 : i32
    return %c0_i32, %c0_i32_0 : i32, i32
  }
  func.func @transform_2(%arg0: i32) -> (i32, i32) {
    %c0_i32 = arith.constant 0 : i32
    %c0_i32_0 = arith.constant 0 : i32
    %c0_i32_1 = arith.constant 0 : i32
    return %c0_i32, %c0_i32_0 : i32, i32
  }
  func.func @transform_3(%arg0: i32) -> (i32, i32) {
    %c0_i32 = arith.constant 0 : i32
    %c0_i32_0 = arith.constant 0 : i32
    return %arg0, %c0_i32 : i32, i32
  }
}

module attributes {stable_mosaic.version = 11 : i64} {
  func.func @_conv_gemm_kernel(%arg0: i32, %arg1: memref<8x1024xbf16, #tpu.memory_space<vmem>>, %arg2: memref<1024x1xbf16, #tpu.memory_space<vmem>>, %arg3: memref<1x1xf32, #tpu.memory_space<vmem>>, %arg4: memref<8x1xf32, #tpu.memory_space<vmem>>) attributes {dimension_semantics = [#tpu.dimension_semantics<parallel>], iteration_bounds = array<i64: 1>, scalar_prefetch = 0 : i64, scratch_operands = 0 : i64, tpu.core_type = #tpu.core_type<tc>, window_params = [{transform_indices = @transform_0, window_bounds = array<i64: 8, 1024>}, {pipeline_mode = #tpu.pipeline_mode<synchronous>, transform_indices = @transform_1, window_bounds = array<i64: 1024, 1>}, {pipeline_mode = #tpu.pipeline_mode<synchronous>, transform_indices = @transform_2, window_bounds = array<i64: 1, 1>}, {transform_indices = @transform_3, window_bounds = array<i64: 8, 1>}]} {
    %c0 = arith.constant 0 : index
    %c0_0 = arith.constant 0 : index
    %0 = vector.load %arg1[%c0, %c0_0] : memref<8x1024xbf16, #tpu.memory_space<vmem>>, vector<8x1024xbf16>
    %c0_1 = arith.constant 0 : index
    %c0_2 = arith.constant 0 : index
    %1 = vector.load %arg2[%c0_1, %c0_2] : memref<1024x1xbf16, #tpu.memory_space<vmem>>, vector<1024x1xbf16>
    %cst = arith.constant dense<0.000000e+00> : vector<8x1xf32>
    %2 = tpu.matmul %0, %1, %cst {dimension_numbers = #tpu.dot_dimension_numbers<[1], [0], [0], [1], [0, 0, 1, 1], [], []>} : vector<8x1024xbf16>, vector<1024x1xbf16>, vector<8x1xf32> -> vector<8x1xf32>
    %c0_3 = arith.constant 0 : index
    %c0_4 = arith.constant 0 : index
    %3 = vector.load %arg3[%c0_3, %c0_4] : memref<1x1xf32, #tpu.memory_space<vmem>>, vector<1x1xf32>
    %4 = vector.broadcast %3 : vector<1x1xf32> to vector<8x1xf32>
    %5 = arith.addf %2, %4 : vector<8x1xf32>
    %c0_5 = arith.constant 0 : index
    %c0_6 = arith.constant 0 : index
    %6 = vector.load %arg4[%c0_5, %c0_6] : memref<8x1xf32, #tpu.memory_space<vmem>>, vector<8x1xf32>
    tpu.vector_store %arg4[%c0_5, %c0_6], %5 {strides = array<i32>} : memref<8x1xf32, #tpu.memory_space<vmem>>, vector<8x1xf32>,
    return
  }
  func.func @transform_0(%arg0: i32) -> (i32, i32) {
    %c0_i32 = arith.constant 0 : i32
    %c0_i32_0 = arith.constant 0 : i32
    return %arg0, %c0_i32 : i32, i32
  }
  func.func @transform_1(%arg0: i32) -> (i32, i32) {
    %c0_i32 = arith.constant 0 : i32
    %c0_i32_0 = arith.constant 0 : i32
    %c0_i32_1 = arith.constant 0 : i32
    return %c0_i32, %c0_i32_0 : i32, i32
  }
  func.func @transform_2(%arg0: i32) -> (i32, i32) {
    %c0_i32 = arith.constant 0 : i32
    %c0_i32_0 = arith.constant 0 : i32
    %c0_i32_1 = arith.constant 0 : i32
    return %c0_i32, %c0_i32_0 : i32, i32
  }
  func.func @transform_3(%arg0: i32) -> (i32, i32) {
    %c0_i32 = arith.constant 0 : i32
    %c0_i32_0 = arith.constant 0 : i32
    return %arg0, %c0_i32 : i32, i32
  }
}

</mosaic_0001>

<bundles_post_ra>
// kernel: fc_discriminator_pallas.5
= control target key start
LH: loop header
LB: loop body
LE: loop exit
PB: predicated region body
PF: predicated region fallthrough
CT: control target
= control target key end

     0   :  { %vm278_vm0 = vcmask 523264   ;;  %vm1112_vm3 = vcmask 60416   ;;  %s2042_s1 = inlined_call_operand.vmem [shape: bf16[64,8], index: 1, kind: input, shape index: {}]   ;;  %s2043_s0 = inlined_call_operand.vmem [shape: bf16[512,64], index: 0, kind: input, shape index: {}]   ;;  %s2044_s2 = inlined_call_operand.vmem [shape: f32[1,8], index: 2, kind: input, shape index: {}]   ;;  %s2045_s3 = inlined_call_operand.vmem [shape: bf16[512,8], index: 3, kind: output, shape index: {}]  }
   0x1   :  { %v1494_v0 = vld [vmem:[%s2042_s1 + $0x18] sm:$0xff]   ;;  %v1495_v1 = vld [vmem:[%s2042_s1 + $0x10] sm:$0xff]   ;;  %v1496_v2 = vld [vmem:[%s2042_s1 + $0x8] sm:$0xff]  }
   0x2   :  { %1414 = vmatprep.subr.bf16.mxu0 %v1494_v0  ;;  %1486 = vmatprep.subr.bf16.mxu1 %v1494_v0  ;;  %v1498_v3 = vld [vmem:[%s2043_s0] sm:$0xff]   ;;  %v1500_v6 = vld [vmem:[%s2043_s0 + $0x8] sm:$0xff]   ;;  %v1502_v8 = vld [vmem:[%s2043_s0 + $0x10] sm:$0xff]  }
   0x3   :  { %1415 = vmatpush3.bf16.msra.mxu0 %v1494_v0  ;;  %1490 = vmatpush3.bf16.msra.mxu1 %v1494_v0  ;;  %v1499_v4 = vld [vmem:[%s2043_s0 + $0x80] sm:$0xff]   ;;  %v1501_v7 = vld [vmem:[%s2043_s0 + $0x88] sm:$0xff]   ;;  %v1503_v9 = vld [vmem:[%s2043_s0 + $0x90] sm:$0xff]  }
   0x4   :  { %1416 = vmatprep.subr.bf16.mxu0 %v1495_v1  ;;  %1487 = vmatprep.subr.bf16.mxu1 %v1495_v1  ;;  %v1497_v5 = vld [vmem:[%s2042_s1] sm:$0xff]   ;;  %v1504_v10 = vld [vmem:[%s2043_s0 + $0x18] sm:$0xff]   ;;  %v1508_v14 = vld [vmem:[%s2043_s0 + $0x28] sm:$0xff]  }
   0x5   :  { %1422 = vmatprep.mubr.msk.bf16.mxu0 %vm278_vm0, %v1498_v3  ;;  %1454 = vmatprep.mubr.msk.bf16.mxu1 %vm278_vm0, %v1499_v4  ;;  %v1505_v11 = vld [vmem:[%s2043_s0 + $0x98] sm:$0xff]   ;;  %v1506_v12 = vld [vmem:[%s2043_s0 + $0x20] sm:$0xff]   ;;  %v1509_v15 = vld [vmem:[%s2043_s0 + $0xa8] sm:$0xff]  }
   0x6   :  { %v1507_v13 = vld [vmem:[%s2043_s0 + $0xa0] sm:$0xff]   ;;  %v1510_v16 = vld [vmem:[%s2043_s0 + $0x30] sm:$0xff]   ;;  %v1512_v18 = vld [vmem:[%s2043_s0 + $0x38] sm:$0xff]  }
   0x7   :  { %1417 = vmatpush3.bf16.msra.mxu0 %v1495_v1  ;;  %1491 = vmatpush3.bf16.msra.mxu1 %v1495_v1  ;;  %v1511_v17 = vld [vmem:[%s2043_s0 + $0xb0] sm:$0xff]   ;;  %v1513_v19 = vld [vmem:[%s2043_s0 + $0xb8] sm:$0xff]   ;;  %v1514_v20 = vld [vmem:[%s2043_s0 + $0x40] sm:$0xff]  }
   0x8   :  { %1418 = vmatprep.subr.bf16.mxu0 %v1496_v2  ;;  %1488 = vmatprep.subr.bf16.mxu1 %v1496_v2  ;;  %v1515_v21 = vld [vmem:[%s2043_s0 + $0xc0] sm:$0xff]   ;;  %v1516_v22 = vld [vmem:[%s2043_s0 + $0x48] sm:$0xff]   ;;  %v1518_v24 = vld [vmem:[%s2043_s0 + $0x50] sm:$0xff]  }
   0x9   :  { %v1517_v23 = vld [vmem:[%s2043_s0 + $0xc8] sm:$0xff]   ;;  %v1519_v25 = vld [vmem:[%s2043_s0 + $0xd0] sm:$0xff]   ;;  %v1520_v26 = vld [vmem:[%s2043_s0 + $0x58] sm:$0xff]  }
   0xa   :  { %v1521_v27 = vld [vmem:[%s2043_s0 + $0xd8] sm:$0xff]   ;;  %v1522_v28 = vld [vmem:[%s2043_s0 + $0x60] sm:$0xff]   ;;  %v1524_v30 = vld [vmem:[%s2043_s0 + $0x68] sm:$0xff]  }
   0xb   :  { %1419 = vmatpush3.bf16.msra.mxu0 %v1496_v2  ;;  %1492 = vmatpush3.bf16.msra.mxu1 %v1496_v2  ;;  %v1523_v29 = vld [vmem:[%s2043_s0 + $0xe0] sm:$0xff]   ;;  %v1525_v31 = vld [vmem:[%s2043_s0 + $0xe8] sm:$0xff]   ;;  %v1526_v32 = vld [vmem:[%s2043_s0 + $0x70] sm:$0xff]  }
   0xc   :  { %1420 = vmatprep.subr.bf16.mxu0 %v1497_v5  ;;  %1489 = vmatprep.subr.bf16.mxu1 %v1497_v5  ;;  %v1527_v33 = vld [vmem:[%s2043_s0 + $0xf0] sm:$0xff]   ;;  %v1528_v34 = vld [vmem:[%s2043_s0 + $0x78] sm:$0xff]   ;;  %v1693_v36 = vld [vmem:[%s2044_s2] ss:$0 sm:$0xff] }
   0xd   :  { %v1529_v35 = vld [vmem:[%s2043_s0 + $0xf8] sm:$0xff]  }
   0xf   :  { %1421 = vmatpush3.bf16.msra.mxu0 %v1497_v5  ;;  %1493 = vmatpush3.bf16.msra.mxu1 %v1497_v5 }
  0x12   :  { %1423 = vmatmul.mubr.msk.bf16.vlgmr.msra.gmra.mxu0 %vm278_vm0, %v1500_v6  ;;  %1455 = vmatmul.mubr.msk.bf16.vlgmr.msra.gmra.mxu1 %vm278_vm0, %v1501_v7 }
  0x13   :  { %1426 = vmatprep.mubr.msk.bf16.mxu0 %vm278_vm0, %v1502_v8  ;;  %1458 = vmatprep.mubr.msk.bf16.mxu1 %vm278_vm0, %v1503_v9 }
  0x1a   :  { %1427 = vmatmul.mubr.msk.bf16.gmra.mxu0 %vm278_vm0, %v1504_v10  ;;  %1459 = vmatmul.mubr.msk.bf16.gmra.mxu1 %vm278_vm0, %v1505_v11 }
  0x1b   :  { %1430 = vmatprep.mubr.msk.bf16.mxu0 %vm278_vm0, %v1506_v12  ;;  %1462 = vmatprep.mubr.msk.bf16.mxu1 %vm278_vm0, %v1507_v13 }
  0x22   :  { %1431 = vmatmul.mubr.msk.bf16.gmra.mxu0 %vm278_vm0, %v1508_v14  ;;  %1463 = vmatmul.mubr.msk.bf16.gmra.mxu1 %vm278_vm0, %v1509_v15 }
  0x23   :  { %1434 = vmatprep.mubr.msk.bf16.mxu0 %vm278_vm0, %v1510_v16  ;;  %1466 = vmatprep.mubr.msk.bf16.mxu1 %vm278_vm0, %v1511_v17 }
  0x2a   :  { %1435 = vmatmul.mubr.msk.bf16.gmra.mxu0 %vm278_vm0, %v1512_v18  ;;  %1467 = vmatmul.mubr.msk.bf16.gmra.mxu1 %vm278_vm0, %v1513_v19 }
  0x2b   :  { %1438 = vmatprep.mubr.msk.bf16.mxu0 %vm278_vm0, %v1514_v20  ;;  %1470 = vmatprep.mubr.msk.bf16.mxu1 %vm278_vm0, %v1515_v21 }
  0x32   :  { %1439 = vmatmul.mubr.msk.bf16.gmra.mxu0 %vm278_vm0, %v1516_v22  ;;  %1471 = vmatmul.mubr.msk.bf16.gmra.mxu1 %vm278_vm0, %v1517_v23 }
  0x33   :  { %1442 = vmatprep.mubr.msk.bf16.mxu0 %vm278_vm0, %v1518_v24  ;;  %1474 = vmatprep.mubr.msk.bf16.mxu1 %vm278_vm0, %v1519_v25 }
  0x3a   :  { %1443 = vmatmul.mubr.msk.bf16.gmra.mxu0 %vm278_vm0, %v1520_v26  ;;  %1475 = vmatmul.mubr.msk.bf16.gmra.mxu1 %vm278_vm0, %v1521_v27 }
  0x3b   :  { %1446 = vmatprep.mubr.msk.bf16.mxu0 %vm278_vm0, %v1522_v28  ;;  %1478 = vmatprep.mubr.msk.bf16.mxu1 %vm278_vm0, %v1523_v29 }
  0x42   :  { %1447 = vmatmul.mubr.msk.bf16.gmra.mxu0 %vm278_vm0, %v1524_v30  ;;  %1479 = vmatmul.mubr.msk.bf16.gmra.mxu1 %vm278_vm0, %v1525_v31 }
  0x43   :  { %1450 = vmatprep.mubr.msk.bf16.mxu0 %vm278_vm0, %v1526_v32  ;;  %1482 = vmatprep.mubr.msk.bf16.mxu1 %vm278_vm0, %v1527_v33 }
  0x4a   :  { %1451 = vmatmul.mubr.msk.bf16.gmra.mxu0 %vm278_vm0, %v1528_v34  ;;  %1483 = vmatmul.mubr.msk.bf16.gmra.mxu1 %vm278_vm0, %v1529_v35 }
  0xd2   :  { %v1424_v37 = vpop.f32.mrf.mxu0  ;;  %v1456_v38 = vpop.f32.mrf.mxu1 }
  0xd3   :  { %v418_v39 = vadd.f32 %v1424_v37, %v1693_v36  ;;  %v546_v40 = vadd.f32 %v1456_v38, %v1693_v36 }
  0xd4   :  { %v409_v41 = vpop.f32.mrf.mxu0  ;;  %v537_v42 = vpop.f32.mrf.mxu1 }
  0xd5   :  { %vm666_vm1 = vcmp.ge.f32.partialorder %v418_v39, 0.0  ;;  %v730_v43 = vmul.f32 0.2, %v418_v39  ;;  %vm698_vm2 = vcmp.ge.f32.partialorder %v546_v40, 0.0  ;;  %v762_v44 = vmul.f32 0.2, %v546_v40 }
  0xd6   :  { %v410_v45 = vadd.f32 %v1693_v36, %v409_v41  ;;  %v538_v46 = vadd.f32 %v1693_v36, %v537_v42  ;;  %v1425_v47 = vpop.f32.mrf.mxu0  ;;  %v1457_v48 = vpop.f32.mrf.mxu1 }
  0xd7   :  { %v794_v49 = vsel %vm666_vm1, %v418_v39, %v730_v43  ;;  %v826_v50 = vsel %vm698_vm2, %v546_v40, %v762_v44  ;;  %v421_v51 = vadd.f32 %v1425_v47, %v1693_v36  ;;  %v549_v52 = vadd.f32 %v1457_v48, %v1693_v36 }
  0xd8   :  { %v1316_v53 = vpack.c.bf16 %v794_v49, %v794_v49  ;;  %v1348_v54 = vpack.c.bf16 %v826_v50, %v826_v50  ;;  %vm664_vm4 = vcmp.ge.f32.partialorder %v410_v45, 0.0  ;;  %v728_v55 = vmul.f32 0.2, %v410_v45  ;;  %v412_v56 = vpop.f32.mrf.mxu0  ;;  %v540_v57 = vpop.f32.mrf.mxu1 }
  0xd9   :  { %vm696_vm5 = vcmp.ge.f32.partialorder %v538_v46, 0.0  ;;  %v760_v58 = vmul.f32 0.2, %v538_v46  ;;  %vm667_vm6 = vcmp.ge.f32.partialorder %v421_v51, 0.0  ;;  %v731_v59 = vmul.f32 0.2, %v421_v51 }
  0xda   :  { %1115 = vst.msk [vmem:[%s2045_s3 + $0x8] sm:$0xf] %vm1112_vm3, %v1316_v53  ;;  %1147 = vst.msk [vmem:[%s2045_s3 + $0x88] sm:$0xf] %vm1112_vm3, %v1348_v54  ;;  %v792_v60 = vsel %vm664_vm4, %v410_v45, %v728_v55  ;;  %vm699_vm7 = vcmp.ge.f32.partialorder %v549_v52, 0.0  ;;  %v413_v62 = vadd.f32 %v1693_v36, %v412_v56  ;;  %v1428_v63 = vpop.f32.mrf.mxu0  ;;  %v1460_v0 = vpop.f32.mrf.mxu1  ;;  %v541_v4 = vadd.f32 %v1693_v36, %v540_v57 }
  0xdb   :  { %v763_v61 = vmul.f32 0.2, %v549_v52  ;;  %v1314_v1 = vpack.c.bf16 %v792_v60, %v792_v60  ;;  %v824_v2 = vsel %vm696_vm5, %v538_v46, %v760_v58  ;;  %v795_v3 = vsel %vm667_vm6, %v421_v51, %v731_v59 }
  0xdc   :  { %v1346_v5 = vpack.c.bf16 %v824_v2, %v824_v2  ;;  %v1317_v6 = vpack.c.bf16 %v795_v3, %v795_v3  ;;  %vm665_vm8 = vcmp.ge.f32.partialorder %v413_v62, 0.0  ;;  %v425_v8 = vpop.f32.mrf.mxu0  ;;  %v553_v9 = vpop.f32.mrf.mxu1  ;;  %v729_v11 = vmul.f32 0.2, %v413_v62 }
  0xdd   :  { %v827_v7 = vsel %vm699_vm7, %v549_v52, %v763_v61  ;;  %1113 = vst.msk [vmem:[%s2045_s3] sm:$0xf] %vm1112_vm3, %v1314_v1  ;;  %vm697_vm9 = vcmp.ge.f32.partialorder %v541_v4, 0.0  ;;  %v761_v12 = vmul.f32 0.2, %v541_v4  ;;  %v434_v13 = vadd.f32 %v1428_v63, %v1693_v36 }
  0xde   :  { %v1349_v10 = vpack.c.bf16 %v827_v7, %v827_v7  ;;  %1145 = vst.msk [vmem:[%s2045_s3 + $0x80] sm:$0xf] %vm1112_vm3, %v1346_v5  ;;  %1116 = vst.msk [vmem:[%s2045_s3 + $0xc] sm:$0xf] %vm1112_vm3, %v1317_v6  ;;  %v562_v14 = vadd.f32 %v1460_v0, %v1693_v36  ;;  %v426_v15 = vadd.f32 %v1693_v36, %v425_v8  ;;  %v1429_v17 = vpop.f32.mrf.mxu0  ;;  %v1461_v18 = vpop.f32.mrf.mxu1 }
  0xdf   :  { %v554_v16 = vadd.f32 %v1693_v36, %v553_v9  ;;  %v793_v19 = vsel %vm665_vm8, %v413_v62, %v729_v11  ;;  %v825_v20 = vsel %vm697_vm9, %v541_v4, %v761_v12  ;;  %v437_v21 = vadd.f32 %v1429_v17, %v1693_v36 }
  0xe0   :  { %1148 = vst.msk [vmem:[%s2045_s3 + $0x8c] sm:$0xf] %vm1112_vm3, %v1349_v10  ;;  %v565_v22 = vadd.f32 %v1461_v18, %v1693_v36  ;;  %v1315_v23 = vpack.c.bf16 %v793_v19, %v793_v19  ;;  %v1347_v24 = vpack.c.bf16 %v825_v20, %v825_v20  ;;  %vm670_vm10 = vcmp.ge.f32.partialorder %v434_v13, 0.0  ;;  %v428_v26 = vpop.f32.mrf.mxu0  ;;  %v556_v27 = vpop.f32.mrf.mxu1 }
  0xe1   :  { %v734_v25 = vmul.f32 0.2, %v434_v13  ;;  %vm702_vm11 = vcmp.ge.f32.partialorder %v562_v14, 0.0  ;;  %v766_v28 = vmul.f32 0.2, %v562_v14  ;;  %vm668_vm12 = vcmp.ge.f32.partialorder %v426_v15, 0.0 }
  0xe2   :  { %v732_v29 = vmul.f32 0.2, %v426_v15  ;;  %1114 = vst.msk [vmem:[%s2045_s3 + $0x4] sm:$0xf] %vm1112_vm3, %v1315_v23  ;;  %1146 = vst.msk [vmem:[%s2045_s3 + $0x84] sm:$0xf] %vm1112_vm3, %v1347_v24  ;;  %v1432_v32 = vpop.f32.mrf.mxu0  ;;  %v1464_v33 = vpop.f32.mrf.mxu1  ;;  %v429_v47 = vadd.f32 %v1693_v36, %v428_v26  ;;  %v557_v49 = vadd.f32 %v1693_v36, %v556_v27 }
  0xe3   :  { %v798_v30 = vsel %vm670_vm10, %v434_v13, %v734_v25  ;;  %vm700_vm13 = vcmp.ge.f32.partialorder %v554_v16, 0.0  ;;  %v764_v31 = vmul.f32 0.2, %v554_v16  ;;  %vm671_vm14 = vcmp.ge.f32.partialorder %v437_v21, 0.0 }
  0xe4   :  { %v1320_v34 = vpack.c.bf16 %v798_v30, %v798_v30  ;;  %v830_v35 = vsel %vm702_vm11, %v562_v14, %v766_v28  ;;  %v796_v37 = vsel %vm668_vm12, %v426_v15, %v732_v29  ;;  %v735_v38 = vmul.f32 0.2, %v437_v21  ;;  %v441_v42 = vpop.f32.mrf.mxu0  ;;  %v569_v43 = vpop.f32.mrf.mxu1 }
  0xe5   :  { %v1352_v39 = vpack.c.bf16 %v830_v35, %v830_v35  ;;  %v1318_v40 = vpack.c.bf16 %v796_v37, %v796_v37  ;;  %v828_v41 = vsel %vm700_vm13, %v554_v16, %v764_v31  ;;  %vm703_vm15 = vcmp.ge.f32.partialorder %v565_v22, 0.0 }
  0xe6   :  { %1119 = vst.msk [vmem:[%s2045_s3 + $0x18] sm:$0xf] %vm1112_vm3, %v1320_v34  ;;  %v1350_v44 = vpack.c.bf16 %v828_v41, %v828_v41  ;;  %v799_v45 = vsel %vm671_vm14, %v437_v21, %v735_v38  ;;  %v767_v46 = vmul.f32 0.2, %v565_v22  ;;  %v450_v50 = vadd.f32 %v1432_v32, %v1693_v36  ;;  %v1433_v52 = vpop.f32.mrf.mxu0  ;;  %v1465_v53 = vpop.f32.mrf.mxu1 }
  0xe7   :  { %1151 = vst.msk [vmem:[%s2045_s3 + $0x98] sm:$0xf] %vm1112_vm3, %v1352_v39  ;;  %1117 = vst.msk [vmem:[%s2045_s3 + $0x10] sm:$0xf] %vm1112_vm3, %v1318_v40  ;;  %v1321_v48 = vpack.c.bf16 %v799_v45, %v799_v45  ;;  %v578_v51 = vadd.f32 %v1464_v33, %v1693_v36  ;;  %vm669_vm0 = vcmp.ge.f32.partialorder %v429_v47, 0.0  ;;  %v442_v56 = vadd.f32 %v1693_v36, %v441_v42 }
  0xe8   :  { %1149 = vst.msk [vmem:[%s2045_s3 + $0x90] sm:$0xf] %vm1112_vm3, %v1350_v44  ;;  %v831_v54 = vsel %vm703_vm15, %v565_v22, %v767_v46  ;;  %v733_v55 = vmul.f32 0.2, %v429_v47  ;;  %vm701_vm1 = vcmp.ge.f32.partialorder %v557_v49, 0.0  ;;  %vm674_vm2 = vcmp.ge.f32.partialorder %v450_v50, 0.0  ;;  %v444_v59 = vpop.f32.mrf.mxu0  ;;  %v572_v60 = vpop.f32.mrf.mxu1 }
  0xe9   :  { %1120 = vst.msk [vmem:[%s2045_s3 + $0x1c] sm:$0xf] %vm1112_vm3, %v1321_v48  ;;  %v1353_v57 = vpack.c.bf16 %v831_v54, %v831_v54  ;;  %v765_v58 = vmul.f32 0.2, %v557_v49  ;;  %v738_v62 = vmul.f32 0.2, %v450_v50  ;;  %v570_v8 = vadd.f32 %v1693_v36, %v569_v43 }
  0xea   :  { %v797_v61 = vsel %vm669_vm0, %v429_v47, %v733_v55  ;;  %vm706_vm4 = vcmp.ge.f32.partialorder %v578_v51, 0.0  ;;  %v770_v63 = vmul.f32 0.2, %v578_v51  ;;  %vm672_vm5 = vcmp.ge.f32.partialorder %v442_v56, 0.0  ;;  %v1436_v3 = vpop.f32.mrf.mxu0  ;;  %v1468_v4 = vpop.f32.mrf.mxu1 }
  0xeb   :  { %1152 = vst.msk [vmem:[%s2045_s3 + $0x9c] sm:$0xf] %vm1112_vm3, %v1353_v57  ;;  %v1319_v0 = vpack.c.bf16 %v797_v61, %v797_v61  ;;  %v829_v1 = vsel %vm701_vm1, %v557_v49, %v765_v58  ;;  %v736_v2 = vmul.f32 0.2, %v442_v56  ;;  %v802_v6 = vsel %vm674_vm2, %v450_v50, %v738_v62 }
  0xec   :  { %v1351_v5 = vpack.c.bf16 %v829_v1, %v829_v1  ;;  %v834_v7 = vsel %vm706_vm4, %v578_v51, %v770_v63  ;;  %v1324_v9 = vpack.c.bf16 %v802_v6, %v802_v6  ;;  %v453_v12 = vadd.f32 %v1433_v52, %v1693_v36  ;;  %v457_v13 = vpop.f32.mrf.mxu0  ;;  %v585_v14 = vpop.f32.mrf.mxu1 }
  0xed   :  { %1118 = vst.msk [vmem:[%s2045_s3 + $0x14] sm:$0xf] %vm1112_vm3, %v1319_v0  ;;  %v1356_v10 = vpack.c.bf16 %v834_v7, %v834_v7  ;;  %v800_v11 = vsel %vm672_vm5, %v442_v56, %v736_v2  ;;  %vm704_vm6 = vcmp.ge.f32.partialorder %v570_v8, 0.0  ;;  %v768_v16 = vmul.f32 0.2, %v570_v8 }
  0xee   :  { %1150 = vst.msk [vmem:[%s2045_s3 + $0x94] sm:$0xf] %vm1112_vm3, %v1351_v5  ;;  %v1322_v15 = vpack.c.bf16 %v800_v11, %v800_v11  ;;  %v581_v17 = vadd.f32 %v1465_v53, %v1693_v36  ;;  %1123 = vst.msk [vmem:[%s2045_s3 + $0x28] sm:$0xf] %vm1112_vm3, %v1324_v9  ;;  %vm675_vm7 = vcmp.ge.f32.partialorder %v453_v12, 0.0  ;;  %v445_v19 = vadd.f32 %v1693_v36, %v444_v59  ;;  %v1437_v21 = vpop.f32.mrf.mxu0  ;;  %v1469_v22 = vpop.f32.mrf.mxu1 }
  0xef   :  { %1155 = vst.msk [vmem:[%s2045_s3 + $0xa8] sm:$0xf] %vm1112_vm3, %v1356_v10  ;;  %v739_v18 = vmul.f32 0.2, %v453_v12  ;;  %v573_v20 = vadd.f32 %v1693_v36, %v572_v60  ;;  %v832_v23 = vsel %vm704_vm6, %v570_v8, %v768_v16  ;;  %v466_v25 = vadd.f32 %v1436_v3, %v1693_v36 }
  0xf0   :  { %1121 = vst.msk [vmem:[%s2045_s3 + $0x20] sm:$0xf] %vm1112_vm3, %v1322_v15  ;;  %vm707_vm8 = vcmp.ge.f32.partialorder %v581_v17, 0.0  ;;  %v771_v24 = vmul.f32 0.2, %v581_v17  ;;  %v1354_v26 = vpack.c.bf16 %v832_v23, %v832_v23  ;;  %vm673_vm9 = vcmp.ge.f32.partialorder %v445_v19, 0.0  ;;  %v460_v29 = vpop.f32.mrf.mxu0  ;;  %v588_v30 = vpop.f32.mrf.mxu1 }
  0xf1   :  { %v803_v27 = vsel %vm675_vm7, %v453_v12, %v739_v18  ;;  %v737_v28 = vmul.f32 0.2, %v445_v19  ;;  %vm705_vm10 = vcmp.ge.f32.partialorder %v573_v20, 0.0  ;;  %v769_v33 = vmul.f32 0.2, %v573_v20 }
  0xf2   :  { %v1325_v31 = vpack.c.bf16 %v803_v27, %v803_v27  ;;  %v835_v32 = vsel %vm707_vm8, %v581_v17, %v771_v24  ;;  %1153 = vst.msk [vmem:[%s2045_s3 + $0xa0] sm:$0xf] %vm1112_vm3, %v1354_v26  ;;  %vm678_vm11 = vcmp.ge.f32.partialorder %v466_v25, 0.0  ;;  %v742_v37 = vmul.f32 0.2, %v466_v25  ;;  %v1440_v38 = vpop.f32.mrf.mxu0  ;;  %v1472_v39 = vpop.f32.mrf.mxu1 }
  0xf3   :  { %v1357_v34 = vpack.c.bf16 %v835_v32, %v835_v32  ;;  %v801_v35 = vsel %vm673_vm9, %v445_v19, %v737_v28  ;;  %v833_v41 = vsel %vm705_vm10, %v573_v20, %v769_v33  ;;  %v594_v42 = vadd.f32 %v1468_v4, %v1693_v36 }
  0xf4   :  { %1124 = vst.msk [vmem:[%s2045_s3 + $0x2c] sm:$0xf] %vm1112_vm3, %v1325_v31  ;;  %v1323_v40 = vpack.c.bf16 %v801_v35, %v801_v35  ;;  %v458_v43 = vadd.f32 %v1693_v36, %v457_v13  ;;  %v1355_v44 = vpack.c.bf16 %v833_v41, %v833_v41  ;;  %v806_v45 = vsel %vm678_vm11, %v466_v25, %v742_v37  ;;  %v473_v48 = vpop.f32.mrf.mxu0  ;;  %v601_v49 = vpop.f32.mrf.mxu1 }
  0xf5   :  { %1156 = vst.msk [vmem:[%s2045_s3 + $0xac] sm:$0xf] %vm1112_vm3, %v1357_v34  ;;  %v586_v46 = vadd.f32 %v1693_v36, %v585_v14  ;;  %v469_v47 = vadd.f32 %v1437_v21, %v1693_v36  ;;  %v1328_v50 = vpack.c.bf16 %v806_v45, %v806_v45  ;;  %vm710_vm12 = vcmp.ge.f32.partialorder %v594_v42, 0.0 }
  0xf6   :  { %1122 = vst.msk [vmem:[%s2045_s3 + $0x24] sm:$0xf] %vm1112_vm3, %v1323_v40  ;;  %v774_v51 = vmul.f32 0.2, %v594_v42  ;;  %vm676_vm13 = vcmp.ge.f32.partialorder %v458_v43, 0.0  ;;  %v1441_v54 = vpop.f32.mrf.mxu0  ;;  %v1473_v55 = vpop.f32.mrf.mxu1  ;;  %v597_v58 = vadd.f32 %v1469_v22, %v1693_v36  ;;  %v461_v59 = vadd.f32 %v1693_v36, %v460_v29 }
  0xf7   :  { %1154 = vst.msk [vmem:[%s2045_s3 + $0xa4] sm:$0xf] %vm1112_vm3, %v1355_v44  ;;  %v740_v52 = vmul.f32 0.2, %v458_v43  ;;  %vm708_vm14 = vcmp.ge.f32.partialorder %v586_v46, 0.0  ;;  %vm679_vm15 = vcmp.ge.f32.partialorder %v469_v47, 0.0  ;;  %v589_v63 = vadd.f32 %v1693_v36, %v588_v30 }
  0xf8   :  { %v772_v53 = vmul.f32 0.2, %v586_v46  ;;  %1127 = vst.msk [vmem:[%s2045_s3 + $0x38] sm:$0xf] %vm1112_vm3, %v1328_v50  ;;  %v838_v56 = vsel %vm710_vm12, %v594_v42, %v774_v51  ;;  %v743_v57 = vmul.f32 0.2, %v469_v47  ;;  %v1829_v0 = vpop.f32.mrf.mxu0  ;;  %v1831_v1 = vpop.f32.mrf.mxu1  ;;  %v482_v11 = vadd.f32 %v1440_v38, %v1693_v36 }
  0xf9   :  { %v1360_v60 = vpack.c.bf16 %v838_v56, %v838_v56  ;;  %v804_v61 = vsel %vm676_vm13, %v458_v43, %v740_v52  ;;  %vm711_vm0 = vcmp.ge.f32.partialorder %v597_v58, 0.0  ;;  %v775_v6 = vmul.f32 0.2, %v597_v58 }
  0xfa   :  { %v836_v62 = vsel %vm708_vm14, %v586_v46, %v772_v53  ;;  %v1326_v2 = vpack.c.bf16 %v804_v61, %v804_v61  ;;  %v807_v4 = vsel %vm679_vm15, %v469_v47, %v743_v57  ;;  %vm677_vm1 = vcmp.ge.f32.partialorder %v461_v59, 0.0  ;;  %v1444_v8 = vpop.f32.mrf.mxu0  ;;  %v1476_v9 = vpop.f32.mrf.mxu1 }
  0xfb   :  { %v1358_v3 = vpack.c.bf16 %v836_v62, %v836_v62  ;;  %1159 = vst.msk [vmem:[%s2045_s3 + $0xb8] sm:$0xf] %vm1112_vm3, %v1360_v60  ;;  %v1329_v5 = vpack.c.bf16 %v807_v4, %v807_v4  ;;  %v741_v7 = vmul.f32 0.2, %v461_v59  ;;  %vm709_vm2 = vcmp.ge.f32.partialorder %v589_v63, 0.0 }
  0xfc   :  { %1125 = vst.msk [vmem:[%s2045_s3 + $0x30] sm:$0xf] %vm1112_vm3, %v1326_v2  ;;  %v773_v10 = vmul.f32 0.2, %v589_v63  ;;  %v610_v12 = vadd.f32 %v1472_v39, %v1693_v36  ;;  %v839_v13 = vsel %vm711_vm0, %v597_v58, %v775_v6  ;;  %v474_v15 = vadd.f32 %v1693_v36, %v473_v48  ;;  %v489_v17 = vpop.f32.mrf.mxu0  ;;  %v1854_v18 = vpop.f32.mrf.mxu1 }
  0xfd   :  { %1157 = vst.msk [vmem:[%s2045_s3 + $0xb0] sm:$0xf] %vm1112_vm3, %v1358_v3  ;;  %1128 = vst.msk [vmem:[%s2045_s3 + $0x3c] sm:$0xf] %vm1112_vm3, %v1329_v5  ;;  %v805_v14 = vsel %vm677_vm1, %v461_v59, %v741_v7  ;;  %v602_v16 = vadd.f32 %v1693_v36, %v601_v49  ;;  %v1361_v19 = vpack.c.bf16 %v839_v13, %v839_v13  ;;  %vm682_vm4 = vcmp.ge.f32.partialorder %v482_v11, 0.0 }
  0xfe   :  { %v1327_v20 = vpack.c.bf16 %v805_v14, %v805_v14  ;;  %v837_v21 = vsel %vm709_vm2, %v589_v63, %v773_v10  ;;  %v746_v23 = vmul.f32 0.2, %v482_v11  ;;  %vm714_vm5 = vcmp.ge.f32.partialorder %v610_v12, 0.0  ;;  %v1856_v25 = vpop.f32.mrf.mxu0  ;;  %v1858_v26 = vpop.f32.mrf.mxu1 }
  0xff   :  { %v1359_v22 = vpack.c.bf16 %v837_v21, %v837_v21  ;;  %v778_v24 = vmul.f32 0.2, %v610_v12  ;;  %1160 = vst.msk [vmem:[%s2045_s3 + $0xbc] sm:$0xf] %vm1112_vm3, %v1361_v19  ;;  %vm680_vm6 = vcmp.ge.f32.partialorder %v474_v15, 0.0  ;;  %vm712_vm7 = vcmp.ge.f32.partialorder %v602_v16, 0.0 }
 0x100   :  { %1126 = vst.msk [vmem:[%s2045_s3 + $0x34] sm:$0xf] %vm1112_vm3, %v1327_v20  ;;  %v744_v27 = vmul.f32 0.2, %v474_v15  ;;  %v776_v28 = vmul.f32 0.2, %v602_v16  ;;  %v810_v29 = vsel %vm682_vm4, %v482_v11, %v746_v23  ;;  %v485_v31 = vadd.f32 %v1441_v54, %v1693_v36  ;;  %v1874_v33 = vpop.f32.mrf.mxu0  ;;  %v1876_v34 = vpop.f32.mrf.mxu1 }
 0x101   :  { %1158 = vst.msk [vmem:[%s2045_s3 + $0xb4] sm:$0xf] %vm1112_vm3, %v1359_v22  ;;  %v842_v30 = vsel %vm714_vm5, %v610_v12, %v778_v24  ;;  %v613_v32 = vadd.f32 %v1473_v55, %v1693_v36  ;;  %v1332_v35 = vpack.c.bf16 %v810_v29, %v810_v29  ;;  %v477_v46 = vadd.f32 %v1693_v36, %v1829_v0 }
 0x102   :  { %v1364_v37 = vpack.c.bf16 %v842_v30, %v842_v30  ;;  %v808_v38 = vsel %vm680_vm6, %v474_v15, %v744_v27  ;;  %v840_v39 = vsel %vm712_vm7, %v602_v16, %v776_v28  ;;  %vm683_vm8 = vcmp.ge.f32.partialorder %v485_v31, 0.0  ;;  %v1448_v43 = vpop.f32.mrf.mxu0  ;;  %v1878_v44 = vpop.f32.mrf.mxu1 }
 0x103   :  { %v1330_v40 = vpack.c.bf16 %v808_v38, %v808_v38  ;;  %v1362_v41 = vpack.c.bf16 %v840_v39, %v840_v39  ;;  %v747_v42 = vmul.f32 0.2, %v485_v31  ;;  %1131 = vst.msk [vmem:[%s2045_s3 + $0x48] sm:$0xf] %vm1112_vm3, %v1332_v35  ;;  %vm715_vm9 = vcmp.ge.f32.partialorder %v613_v32, 0.0 }
 0x104   :  { %1163 = vst.msk [vmem:[%s2045_s3 + $0xc8] sm:$0xf] %vm1112_vm3, %v1364_v37  ;;  %v779_v45 = vmul.f32 0.2, %v613_v32  ;;  %v605_v47 = vadd.f32 %v1693_v36, %v1831_v1  ;;  %v498_v49 = vadd.f32 %v1444_v8, %v1693_v36  ;;  %v626_v50 = vadd.f32 %v1476_v9, %v1693_v36  ;;  %v505_v57 = vpop.f32.mrf.mxu0  ;;  %v633_v58 = vpop.f32.mrf.mxu1 }
 0x105   :  { %1129 = vst.msk [vmem:[%s2045_s3 + $0x40] sm:$0xf] %vm1112_vm3, %v1330_v40  ;;  %1161 = vst.msk [vmem:[%s2045_s3 + $0xc0] sm:$0xf] %vm1112_vm3, %v1362_v41  ;;  %v811_v48 = vsel %vm683_vm8, %v485_v31, %v747_v42  ;;  %v490_v51 = vadd.f32 %v1693_v36, %v489_v17  ;;  %vm681_vm10 = vcmp.ge.f32.partialorder %v477_v46, 0.0  ;;  %v618_v4 = vadd.f32 %v1693_v36, %v1854_v18 }
 0x106   :  { %v1333_v52 = vpack.c.bf16 %v811_v48, %v811_v48  ;;  %v843_v53 = vsel %vm715_vm9, %v613_v32, %v779_v45  ;;  %v745_v54 = vmul.f32 0.2, %v477_v46  ;;  %vm713_vm11 = vcmp.ge.f32.partialorder %v605_v47, 0.0  ;;  %v1449_v9 = vpop.f32.mrf.mxu0  ;;  %v1481_v10 = vpop.f32.mrf.mxu1 }
 0x107   :  { %v1365_v55 = vpack.c.bf16 %v843_v53, %v843_v53  ;;  %v777_v56 = vmul.f32 0.2, %v605_v47  ;;  %vm686_vm12 = vcmp.ge.f32.partialorder %v498_v49, 0.0  ;;  %v750_v60 = vmul.f32 0.2, %v498_v49 }
 0x108   :  { %1132 = vst.msk [vmem:[%s2045_s3 + $0x4c] sm:$0xf] %vm1112_vm3, %v1333_v52  ;;  %v809_v59 = vsel %vm681_vm10, %v477_v46, %v745_v54  ;;  %vm718_vm13 = vcmp.ge.f32.partialorder %v626_v50, 0.0  ;;  %v782_v61 = vmul.f32 0.2, %v626_v50  ;;  %vm684_vm14 = vcmp.ge.f32.partialorder %v490_v51, 0.0  ;;  %v508_v23 = vpop.f32.mrf.mxu0  ;;  %v636_v24 = vpop.f32.mrf.mxu1 }
 0x109   :  { %1164 = vst.msk [vmem:[%s2045_s3 + $0xcc] sm:$0xf] %vm1112_vm3, %v1365_v55  ;;  %v1331_v62 = vpack.c.bf16 %v809_v59, %v809_v59  ;;  %v841_v63 = vsel %vm713_vm11, %v605_v47, %v777_v56  ;;  %v748_v0 = vmul.f32 0.2, %v490_v51  ;;  %v814_v2 = vsel %vm686_vm12, %v498_v49, %v750_v60 }
 0x10a   :  { %v1363_v1 = vpack.c.bf16 %v841_v63, %v841_v63  ;;  %v846_v3 = vsel %vm718_vm13, %v626_v50, %v782_v61  ;;  %v1336_v5 = vpack.c.bf16 %v814_v2, %v814_v2  ;;  %v501_v8 = vadd.f32 %v1856_v25, %v1693_v36  ;;  %v1452_v40 = vpop.f32.mrf.mxu0  ;;  %v1484_v41 = vpop.f32.mrf.mxu1 }
 0x10b   :  { %1130 = vst.msk [vmem:[%s2045_s3 + $0x44] sm:$0xf] %vm1112_vm3, %v1331_v62  ;;  %v1368_v6 = vpack.c.bf16 %v846_v3, %v846_v3  ;;  %v812_v7 = vsel %vm684_vm14, %v490_v51, %v748_v0  ;;  %vm716_vm15 = vcmp.ge.f32.partialorder %v618_v4, 0.0  ;;  %v780_v12 = vmul.f32 0.2, %v618_v4 }
 0x10c   :  { %1162 = vst.msk [vmem:[%s2045_s3 + $0xc4] sm:$0xf] %vm1112_vm3, %v1363_v1  ;;  %v1334_v11 = vpack.c.bf16 %v812_v7, %v812_v7  ;;  %v629_v13 = vadd.f32 %v1858_v26, %v1693_v36  ;;  %1135 = vst.msk [vmem:[%s2045_s3 + $0x58] sm:$0xf] %vm1112_vm3, %v1336_v5  ;;  %vm687_vm0 = vcmp.ge.f32.partialorder %v501_v8, 0.0  ;;  %v493_v15 = vadd.f32 %v1693_v36, %v1874_v33  ;;  %v521_v54 = vpop.f32.mrf.mxu0  ;;  %v649_v55 = vpop.f32.mrf.mxu1 }
 0x10d   :  { %1167 = vst.msk [vmem:[%s2045_s3 + $0xd8] sm:$0xf] %vm1112_vm3, %v1368_v6  ;;  %v751_v14 = vmul.f32 0.2, %v501_v8  ;;  %v621_v16 = vadd.f32 %v1693_v36, %v1876_v34  ;;  %v844_v17 = vsel %vm716_vm15, %v618_v4, %v780_v12  ;;  %v514_v19 = vadd.f32 %v1448_v43, %v1693_v36 }
 0x10e   :  { %1133 = vst.msk [vmem:[%s2045_s3 + $0x50] sm:$0xf] %vm1112_vm3, %v1334_v11  ;;  %vm719_vm1 = vcmp.ge.f32.partialorder %v629_v13, 0.0  ;;  %v783_v18 = vmul.f32 0.2, %v629_v13  ;;  %v1366_v20 = vpack.c.bf16 %v844_v17, %v844_v17  ;;  %vm685_vm2 = vcmp.ge.f32.partialorder %v493_v15, 0.0  ;;  %v1453_v5 = vpop.f32.mrf.mxu0  ;;  %v1485_v6 = vpop.f32.mrf.mxu1 }
 0x10f   :  { %v815_v21 = vsel %vm687_vm0, %v501_v8, %v751_v14  ;;  %v749_v22 = vmul.f32 0.2, %v493_v15  ;;  %vm717_vm4 = vcmp.ge.f32.partialorder %v621_v16, 0.0  ;;  %v781_v27 = vmul.f32 0.2, %v621_v16 }
 0x110   :  { %v1337_v25 = vpack.c.bf16 %v815_v21, %v815_v21  ;;  %v847_v26 = vsel %vm719_vm1, %v629_v13, %v783_v18  ;;  %1165 = vst.msk [vmem:[%s2045_s3 + $0xd0] sm:$0xf] %vm1112_vm3, %v1366_v20  ;;  %vm690_vm5 = vcmp.ge.f32.partialorder %v514_v19, 0.0  ;;  %v754_v30 = vmul.f32 0.2, %v514_v19  ;;  %v652_v20 = vpop.f32.mrf.mxu1 }
 0x111   :  { %v1369_v28 = vpack.c.bf16 %v847_v26, %v847_v26  ;;  %v813_v29 = vsel %vm685_vm2, %v493_v15, %v749_v22  ;;  %v845_v32 = vsel %vm717_vm4, %v621_v16, %v781_v27  ;;  %v642_v33 = vadd.f32 %v1878_v44, %v1693_v36 }
 0x112   :  { %1136 = vst.msk [vmem:[%s2045_s3 + $0x5c] sm:$0xf] %vm1112_vm3, %v1337_v25  ;;  %v1335_v31 = vpack.c.bf16 %v813_v29, %v813_v29  ;;  %v506_v34 = vadd.f32 %v1693_v36, %v505_v57  ;;  %v1367_v35 = vpack.c.bf16 %v845_v32, %v845_v32  ;;  %v818_v37 = vsel %vm690_vm5, %v514_v19, %v754_v30  ;;  %v524_v19 = vpop.f32.mrf.mxu0 }
 0x113   :  { %1168 = vst.msk [vmem:[%s2045_s3 + $0xdc] sm:$0xf] %vm1112_vm3, %v1369_v28  ;;  %v634_v38 = vadd.f32 %v1693_v36, %v633_v58  ;;  %v517_v39 = vadd.f32 %v1449_v9, %v1693_v36  ;;  %v1340_v42 = vpack.c.bf16 %v818_v37, %v818_v37  ;;  %vm722_vm6 = vcmp.ge.f32.partialorder %v642_v33, 0.0 }
 0x114   :  { %1134 = vst.msk [vmem:[%s2045_s3 + $0x54] sm:$0xf] %vm1112_vm3, %v1335_v31  ;;  %v786_v43 = vmul.f32 0.2, %v642_v33  ;;  %vm688_vm7 = vcmp.ge.f32.partialorder %v506_v34, 0.0  ;;  %v645_v48 = vadd.f32 %v1481_v10, %v1693_v36  ;;  %v509_v49 = vadd.f32 %v1693_v36, %v508_v23 }
 0x115   :  { %1166 = vst.msk [vmem:[%s2045_s3 + $0xd4] sm:$0xf] %vm1112_vm3, %v1367_v35  ;;  %v752_v44 = vmul.f32 0.2, %v506_v34  ;;  %vm720_vm8 = vcmp.ge.f32.partialorder %v634_v38, 0.0  ;;  %vm691_vm9 = vcmp.ge.f32.partialorder %v517_v39, 0.0  ;;  %v637_v53 = vadd.f32 %v1693_v36, %v636_v24 }
 0x116   :  { %v784_v45 = vmul.f32 0.2, %v634_v38  ;;  %1139 = vst.msk [vmem:[%s2045_s3 + $0x68] sm:$0xf] %vm1112_vm3, %v1340_v42  ;;  %v850_v46 = vsel %vm722_vm6, %v642_v33, %v786_v43  ;;  %v755_v47 = vmul.f32 0.2, %v517_v39  ;;  %v530_v63 = vadd.f32 %v1452_v40, %v1693_v36 }
 0x117   :  { %v1372_v50 = vpack.c.bf16 %v850_v46, %v850_v46  ;;  %v816_v51 = vsel %vm688_vm7, %v506_v34, %v752_v44  ;;  %vm723_vm10 = vcmp.ge.f32.partialorder %v645_v48, 0.0  ;;  %v787_v60 = vmul.f32 0.2, %v645_v48 }
 0x118   :  { %v848_v52 = vsel %vm720_vm8, %v634_v38, %v784_v45  ;;  %v1338_v56 = vpack.c.bf16 %v816_v51, %v816_v51  ;;  %v819_v58 = vsel %vm691_vm9, %v517_v39, %v755_v47  ;;  %vm689_vm11 = vcmp.ge.f32.partialorder %v509_v49, 0.0 }
 0x119   :  { %v1370_v57 = vpack.c.bf16 %v848_v52, %v848_v52  ;;  %1171 = vst.msk [vmem:[%s2045_s3 + $0xe8] sm:$0xf] %vm1112_vm3, %v1372_v50  ;;  %v1341_v59 = vpack.c.bf16 %v819_v58, %v819_v58  ;;  %v753_v61 = vmul.f32 0.2, %v509_v49  ;;  %vm721_vm12 = vcmp.ge.f32.partialorder %v637_v53, 0.0 }
 0x11a   :  { %1137 = vst.msk [vmem:[%s2045_s3 + $0x60] sm:$0xf] %vm1112_vm3, %v1338_v56  ;;  %v785_v62 = vmul.f32 0.2, %v637_v53  ;;  %v658_v0 = vadd.f32 %v1484_v41, %v1693_v36  ;;  %v851_v1 = vsel %vm723_vm10, %v645_v48, %v787_v60  ;;  %v522_v3 = vadd.f32 %v1693_v36, %v521_v54 }
 0x11b   :  { %1169 = vst.msk [vmem:[%s2045_s3 + $0xe0] sm:$0xf] %vm1112_vm3, %v1370_v57  ;;  %1140 = vst.msk [vmem:[%s2045_s3 + $0x6c] sm:$0xf] %vm1112_vm3, %v1341_v59  ;;  %v817_v2 = vsel %vm689_vm11, %v509_v49, %v753_v61  ;;  %v650_v4 = vadd.f32 %v1693_v36, %v649_v55  ;;  %v1373_v7 = vpack.c.bf16 %v851_v1, %v851_v1  ;;  %vm694_vm13 = vcmp.ge.f32.partialorder %v530_v63, 0.0 }
 0x11c   :  { %v1339_v8 = vpack.c.bf16 %v817_v2, %v817_v2  ;;  %v849_v9 = vsel %vm721_vm12, %v637_v53, %v785_v62  ;;  %v758_v11 = vmul.f32 0.2, %v530_v63  ;;  %vm726_vm14 = vcmp.ge.f32.partialorder %v658_v0, 0.0 }
 0x11d   :  { %v1371_v10 = vpack.c.bf16 %v849_v9, %v849_v9  ;;  %v790_v12 = vmul.f32 0.2, %v658_v0  ;;  %1172 = vst.msk [vmem:[%s2045_s3 + $0xec] sm:$0xf] %vm1112_vm3, %v1373_v7  ;;  %vm692_vm15 = vcmp.ge.f32.partialorder %v522_v3, 0.0  ;;  %vm724_vm0 = vcmp.ge.f32.partialorder %v650_v4, 0.0 }
 0x11e   :  { %1138 = vst.msk [vmem:[%s2045_s3 + $0x64] sm:$0xf] %vm1112_vm3, %v1339_v8  ;;  %v756_v13 = vmul.f32 0.2, %v522_v3  ;;  %v788_v14 = vmul.f32 0.2, %v650_v4  ;;  %v822_v15 = vsel %vm694_vm13, %v530_v63, %v758_v11  ;;  %v533_v17 = vadd.f32 %v1453_v5, %v1693_v36 }
 0x11f   :  { %1170 = vst.msk [vmem:[%s2045_s3 + $0xe4] sm:$0xf] %vm1112_vm3, %v1371_v10  ;;  %v854_v16 = vsel %vm726_vm14, %v658_v0, %v790_v12  ;;  %v661_v18 = vadd.f32 %v1485_v6, %v1693_v36  ;;  %v1344_v21 = vpack.c.bf16 %v822_v15, %v822_v15  ;;  %v525_v29 = vadd.f32 %v1693_v36, %v524_v19 }
 0x120   :  { %v1376_v22 = vpack.c.bf16 %v854_v16, %v854_v16  ;;  %v820_v23 = vsel %vm692_vm15, %v522_v3, %v756_v13  ;;  %v852_v24 = vsel %vm724_vm0, %v650_v4, %v788_v14  ;;  %vm695_vm1 = vcmp.ge.f32.partialorder %v533_v17, 0.0 }
 0x121   :  { %v1342_v25 = vpack.c.bf16 %v820_v23, %v820_v23  ;;  %v1374_v26 = vpack.c.bf16 %v852_v24, %v852_v24  ;;  %v759_v27 = vmul.f32 0.2, %v533_v17  ;;  %1143 = vst.msk [vmem:[%s2045_s3 + $0x78] sm:$0xf] %vm1112_vm3, %v1344_v21  ;;  %vm727_vm2 = vcmp.ge.f32.partialorder %v661_v18, 0.0 }
 0x122   :  { %1175 = vst.msk [vmem:[%s2045_s3 + $0xf8] sm:$0xf] %vm1112_vm3, %v1376_v22  ;;  %v791_v28 = vmul.f32 0.2, %v661_v18  ;;  %v653_v30 = vadd.f32 %v1693_v36, %v652_v20  ;;  %vm693_vm4 = vcmp.ge.f32.partialorder %v525_v29, 0.0 }
 0x123   :  { %1141 = vst.msk [vmem:[%s2045_s3 + $0x70] sm:$0xf] %vm1112_vm3, %v1342_v25  ;;  %1173 = vst.msk [vmem:[%s2045_s3 + $0xf0] sm:$0xf] %vm1112_vm3, %v1374_v26  ;;  %v823_v31 = vsel %vm695_vm1, %v533_v17, %v759_v27  ;;  %v757_v34 = vmul.f32 0.2, %v525_v29 }
 0x124   :  { %v1345_v32 = vpack.c.bf16 %v823_v31, %v823_v31  ;;  %v855_v33 = vsel %vm727_vm2, %v661_v18, %v791_v28  ;;  %vm725_vm5 = vcmp.ge.f32.partialorder %v653_v30, 0.0  ;;  %v789_v37 = vmul.f32 0.2, %v653_v30 }
 0x125   :  { %v1377_v35 = vpack.c.bf16 %v855_v33, %v855_v33  ;;  %v821_v36 = vsel %vm693_vm4, %v525_v29, %v757_v34 }
 0x126   :  { %1144 = vst.msk [vmem:[%s2045_s3 + $0x7c] sm:$0xf] %vm1112_vm3, %v1345_v32  ;;  %v1343_v38 = vpack.c.bf16 %v821_v36, %v821_v36  ;;  %v853_v39 = vsel %vm725_vm5, %v653_v30, %v789_v37 }
 0x127   :  { %1176 = vst.msk [vmem:[%s2045_s3 + $0xfc] sm:$0xf] %vm1112_vm3, %v1377_v35  ;;  %v1375_v40 = vpack.c.bf16 %v853_v39, %v853_v39 }
 0x128   :  { %1142 = vst.msk [vmem:[%s2045_s3 + $0x74] sm:$0xf] %vm1112_vm3, %v1343_v38 }
 0x129   :  { %1174 = vst.msk [vmem:[%s2045_s3 + $0xf4] sm:$0xf] %vm1112_vm3, %v1375_v40 }

// kernel: fc_discriminator_pallas.6
= control target key start
LH: loop header
LB: loop body
LE: loop exit
PB: predicated region body
PF: predicated region fallthrough
CT: control target
= control target key end

     0   :  { %vm359_vm2 = vcmask 125952   ;;  %s663_s1 = inlined_call_operand.vmem [shape: bf16[128,16], index: 1, kind: input, shape index: {}]   ;;  %s664_s0 = inlined_call_operand.vmem [shape: bf16[128,128], index: 0, kind: input, shape index: {}]   ;;  %s665_s2 = inlined_call_operand.vmem [shape: f32[1,16], index: 2, kind: input, shape index: {}]   ;;  %s666_s3 = inlined_call_operand.vmem [shape: bf16[128,16], index: 3, kind: output, shape index: {}]  }
   0x1   :  { %v493_v0 = vld [vmem:[%s663_s1 + $0x38] sm:$0xff]   ;;  %v494_v1 = vld [vmem:[%s663_s1 + $0x30] sm:$0xff]   ;;  %v495_v2 = vld [vmem:[%s663_s1 + $0x28] sm:$0xff]  }
   0x2   :  { %445 = vmatprep.subr.bf16.mxu0 %v493_v0  ;;  %477 = vmatprep.subr.bf16.mxu1 %v493_v0  ;;  %v496_v3 = vld [vmem:[%s663_s1 + $0x20] sm:$0xff]   ;;  %v497_v6 = vld [vmem:[%s663_s1 + $0x18] sm:$0xff]   ;;  %v498_v7 = vld [vmem:[%s663_s1 + $0x10] sm:$0xff]  }
   0x3   :  { %446 = vmatpush3.bf16.msra.mxu0 %v493_v0  ;;  %485 = vmatpush3.bf16.msra.mxu1 %v493_v0  ;;  %v501_v4 = vld [vmem:[%s664_s0] sm:$0xff]   ;;  %v499_v8 = vld [vmem:[%s663_s1 + $0x8] sm:$0xff]   ;;  %v505_v12 = vld [vmem:[%s664_s0 + $0x10] sm:$0xff]  }
   0x4   :  { %447 = vmatprep.subr.bf16.mxu0 %v494_v1  ;;  %478 = vmatprep.subr.bf16.mxu1 %v494_v1  ;;  %v502_v5 = vld [vmem:[%s664_s0 + $0x20] sm:$0xff]   ;;  %v503_v10 = vld [vmem:[%s664_s0 + $0x8] sm:$0xff]   ;;  %v506_v13 = vld [vmem:[%s664_s0 + $0x30] sm:$0xff]  }
   0x5   :  { %461 = vmatprep.mubr.bf16.mxu0 %v501_v4  ;;  %469 = vmatprep.mubr.bf16.mxu1 %v502_v5  ;;  %v500_v9 = vld [vmem:[%s663_s1] sm:$0xff]   ;;  %v504_v11 = vld [vmem:[%s664_s0 + $0x28] sm:$0xff]   ;;  %v507_v14 = vld [vmem:[%s664_s0 + $0x18] sm:$0xff]  }
   0x6   :  { %v508_v15 = vld [vmem:[%s664_s0 + $0x38] sm:$0xff]   ;;  %v580_v16 = vld [vmem:[%s665_s2] ss:$0 sm:$0xff] }
   0x7   :  { %448 = vmatpush3.bf16.msra.mxu0 %v494_v1  ;;  %486 = vmatpush3.bf16.msra.mxu1 %v494_v1 }
   0x8   :  { %449 = vmatprep.subr.bf16.mxu0 %v495_v2  ;;  %479 = vmatprep.subr.bf16.mxu1 %v495_v2 }
   0xb   :  { %450 = vmatpush3.bf16.msra.mxu0 %v495_v2  ;;  %487 = vmatpush3.bf16.msra.mxu1 %v495_v2 }
   0xc   :  { %451 = vmatprep.subr.bf16.mxu0 %v496_v3  ;;  %480 = vmatprep.subr.bf16.mxu1 %v496_v3 }
   0xf   :  { %452 = vmatpush3.bf16.msra.mxu0 %v496_v3  ;;  %488 = vmatpush3.bf16.msra.mxu1 %v496_v3 }
  0x10   :  { %453 = vmatprep.subr.bf16.mxu0 %v497_v6  ;;  %481 = vmatprep.subr.bf16.mxu1 %v497_v6 }
  0x13   :  { %454 = vmatpush3.bf16.msra.mxu0 %v497_v6  ;;  %489 = vmatpush3.bf16.msra.mxu1 %v497_v6 }
  0x14   :  { %455 = vmatprep.subr.bf16.mxu0 %v498_v7  ;;  %482 = vmatprep.subr.bf16.mxu1 %v498_v7 }
  0x17   :  { %456 = vmatpush3.bf16.msra.mxu0 %v498_v7  ;;  %490 = vmatpush3.bf16.msra.mxu1 %v498_v7 }
  0x18   :  { %457 = vmatprep.subr.bf16.mxu0 %v499_v8  ;;  %483 = vmatprep.subr.bf16.mxu1 %v499_v8 }
  0x1b   :  { %458 = vmatpush3.bf16.msra.mxu0 %v499_v8  ;;  %491 = vmatpush3.bf16.msra.mxu1 %v499_v8 }
  0x1c   :  { %459 = vmatprep.subr.bf16.mxu0 %v500_v9  ;;  %484 = vmatprep.subr.bf16.mxu1 %v500_v9 }
  0x1f   :  { %460 = vmatpush3.bf16.msra.mxu0 %v500_v9  ;;  %492 = vmatpush3.bf16.msra.mxu1 %v500_v9 }
  0x22   :  { %462 = vmatmul.mubr.bf16.vlgmr.msra.gmra.mxu0 %v503_v10  ;;  %470 = vmatmul.mubr.bf16.vlgmr.msra.gmra.mxu1 %v504_v11 }
  0x23   :  { %465 = vmatprep.mubr.bf16.mxu0 %v505_v12  ;;  %473 = vmatprep.mubr.bf16.mxu1 %v506_v13 }
  0x2a   :  { %466 = vmatmul.mubr.bf16.gmra.mxu0 %v507_v14  ;;  %474 = vmatmul.mubr.bf16.gmra.mxu1 %v508_v15 }
  0xe2   :  { %v463_v17 = vpop.f32.mrf.mxu0  ;;  %v471_v18 = vpop.f32.mrf.mxu1 }
  0xe3   :  { %v193_v19 = vadd.f32 %v463_v17, %v580_v16  ;;  %v225_v20 = vadd.f32 %v471_v18, %v580_v16 }
  0xe4   :  { %v184_v21 = vpop.f32.mrf.mxu0  ;;  %v216_v22 = vpop.f32.mrf.mxu1 }
  0xe5   :  { %vm249_vm0 = vcmp.ge.f32.partialorder %v193_v19, 0.0  ;;  %v265_v23 = vmul.f32 0.2, %v193_v19  ;;  %vm257_vm1 = vcmp.ge.f32.partialorder %v225_v20, 0.0  ;;  %v273_v24 = vmul.f32 0.2, %v225_v20 }
  0xe6   :  { %v185_v25 = vadd.f32 %v580_v16, %v184_v21  ;;  %v217_v26 = vadd.f32 %v580_v16, %v216_v22  ;;  %v464_v27 = vpop.f32.mrf.mxu0  ;;  %v472_v28 = vpop.f32.mrf.mxu1 }
  0xe7   :  { %v281_v29 = vsel %vm249_vm0, %v193_v19, %v265_v23  ;;  %v289_v30 = vsel %vm257_vm1, %v225_v20, %v273_v24  ;;  %v196_v31 = vadd.f32 %v464_v27, %v580_v16  ;;  %v228_v32 = vadd.f32 %v472_v28, %v580_v16 }
  0xe8   :  { %v415_v33 = vpack.c.bf16 %v281_v29, %v281_v29  ;;  %v423_v34 = vpack.c.bf16 %v289_v30, %v289_v30  ;;  %vm247_vm3 = vcmp.ge.f32.partialorder %v185_v25, 0.0  ;;  %v263_v35 = vmul.f32 0.2, %v185_v25  ;;  %v187_v36 = vpop.f32.mrf.mxu0  ;;  %v219_v37 = vpop.f32.mrf.mxu1 }
  0xe9   :  { %vm255_vm4 = vcmp.ge.f32.partialorder %v217_v26, 0.0  ;;  %v271_v38 = vmul.f32 0.2, %v217_v26  ;;  %vm250_vm5 = vcmp.ge.f32.partialorder %v196_v31, 0.0  ;;  %v266_v39 = vmul.f32 0.2, %v196_v31 }
  0xea   :  { %362 = vst.msk [vmem:[%s666_s3 + $0x8] sm:$0xf] %vm359_vm2, %v415_v33  ;;  %370 = vst.msk [vmem:[%s666_s3 + $0x28] sm:$0xf] %vm359_vm2, %v423_v34  ;;  %v279_v40 = vsel %vm247_vm3, %v185_v25, %v263_v35  ;;  %vm258_vm6 = vcmp.ge.f32.partialorder %v228_v32, 0.0  ;;  %v188_v42 = vadd.f32 %v580_v16, %v187_v36  ;;  %v467_v43 = vpop.f32.mrf.mxu0  ;;  %v475_v44 = vpop.f32.mrf.mxu1  ;;  %v220_v48 = vadd.f32 %v580_v16, %v219_v37 }
  0xeb   :  { %v274_v41 = vmul.f32 0.2, %v228_v32  ;;  %v413_v45 = vpack.c.bf16 %v279_v40, %v279_v40  ;;  %v287_v46 = vsel %vm255_vm4, %v217_v26, %v271_v38  ;;  %v282_v47 = vsel %vm250_vm5, %v196_v31, %v266_v39 }
  0xec   :  { %v421_v49 = vpack.c.bf16 %v287_v46, %v287_v46  ;;  %v416_v50 = vpack.c.bf16 %v282_v47, %v282_v47  ;;  %vm248_vm7 = vcmp.ge.f32.partialorder %v188_v42, 0.0  ;;  %v200_v52 = vpop.f32.mrf.mxu0  ;;  %v232_v53 = vpop.f32.mrf.mxu1  ;;  %v264_v55 = vmul.f32 0.2, %v188_v42 }
  0xed   :  { %v290_v51 = vsel %vm258_vm6, %v228_v32, %v274_v41  ;;  %360 = vst.msk [vmem:[%s666_s3] sm:$0xf] %vm359_vm2, %v413_v45  ;;  %vm256_vm8 = vcmp.ge.f32.partialorder %v220_v48, 0.0  ;;  %v272_v56 = vmul.f32 0.2, %v220_v48  ;;  %v209_v57 = vadd.f32 %v467_v43, %v580_v16 }
  0xee   :  { %v424_v54 = vpack.c.bf16 %v290_v51, %v290_v51  ;;  %368 = vst.msk [vmem:[%s666_s3 + $0x20] sm:$0xf] %vm359_vm2, %v421_v49  ;;  %363 = vst.msk [vmem:[%s666_s3 + $0xc] sm:$0xf] %vm359_vm2, %v416_v50  ;;  %v241_v58 = vadd.f32 %v475_v44, %v580_v16  ;;  %v201_v59 = vadd.f32 %v580_v16, %v200_v52  ;;  %v468_v61 = vpop.f32.mrf.mxu0  ;;  %v476_v62 = vpop.f32.mrf.mxu1 }
  0xef   :  { %v233_v60 = vadd.f32 %v580_v16, %v232_v53  ;;  %v280_v63 = vsel %vm248_vm7, %v188_v42, %v264_v55  ;;  %v288_v0 = vsel %vm256_vm8, %v220_v48, %v272_v56  ;;  %v212_v1 = vadd.f32 %v468_v61, %v580_v16 }
  0xf0   :  { %371 = vst.msk [vmem:[%s666_s3 + $0x2c] sm:$0xf] %vm359_vm2, %v424_v54  ;;  %v244_v2 = vadd.f32 %v476_v62, %v580_v16  ;;  %v414_v3 = vpack.c.bf16 %v280_v63, %v280_v63  ;;  %v422_v4 = vpack.c.bf16 %v288_v0, %v288_v0  ;;  %vm253_vm9 = vcmp.ge.f32.partialorder %v209_v57, 0.0  ;;  %v203_v10 = vpop.f32.mrf.mxu0  ;;  %v235_v15 = vpop.f32.mrf.mxu1 }
  0xf1   :  { %v269_v5 = vmul.f32 0.2, %v209_v57  ;;  %vm261_vm10 = vcmp.ge.f32.partialorder %v241_v58, 0.0  ;;  %v277_v6 = vmul.f32 0.2, %v241_v58  ;;  %vm251_vm11 = vcmp.ge.f32.partialorder %v201_v59, 0.0 }
  0xf2   :  { %v267_v7 = vmul.f32 0.2, %v201_v59  ;;  %361 = vst.msk [vmem:[%s666_s3 + $0x4] sm:$0xf] %vm359_vm2, %v414_v3  ;;  %369 = vst.msk [vmem:[%s666_s3 + $0x24] sm:$0xf] %vm359_vm2, %v422_v4  ;;  %v204_v23 = vadd.f32 %v580_v16, %v203_v10  ;;  %v236_v25 = vadd.f32 %v580_v16, %v235_v15 }
  0xf3   :  { %v285_v8 = vsel %vm253_vm9, %v209_v57, %v269_v5  ;;  %vm259_vm12 = vcmp.ge.f32.partialorder %v233_v60, 0.0  ;;  %v275_v9 = vmul.f32 0.2, %v233_v60  ;;  %vm254_vm13 = vcmp.ge.f32.partialorder %v212_v1, 0.0 }
  0xf4   :  { %v419_v11 = vpack.c.bf16 %v285_v8, %v285_v8  ;;  %v293_v12 = vsel %vm261_vm10, %v241_v58, %v277_v6  ;;  %v283_v13 = vsel %vm251_vm11, %v201_v59, %v267_v7  ;;  %v270_v14 = vmul.f32 0.2, %v212_v1 }
  0xf5   :  { %v427_v17 = vpack.c.bf16 %v293_v12, %v293_v12  ;;  %v417_v18 = vpack.c.bf16 %v283_v13, %v283_v13  ;;  %v291_v19 = vsel %vm259_vm12, %v233_v60, %v275_v9  ;;  %vm262_vm14 = vcmp.ge.f32.partialorder %v244_v2, 0.0 }
  0xf6   :  { %366 = vst.msk [vmem:[%s666_s3 + $0x18] sm:$0xf] %vm359_vm2, %v419_v11  ;;  %v425_v20 = vpack.c.bf16 %v291_v19, %v291_v19  ;;  %v286_v21 = vsel %vm254_vm13, %v212_v1, %v270_v14  ;;  %v278_v22 = vmul.f32 0.2, %v244_v2  ;;  %vm252_vm15 = vcmp.ge.f32.partialorder %v204_v23, 0.0 }
  0xf7   :  { %374 = vst.msk [vmem:[%s666_s3 + $0x38] sm:$0xf] %vm359_vm2, %v427_v17  ;;  %364 = vst.msk [vmem:[%s666_s3 + $0x10] sm:$0xf] %vm359_vm2, %v417_v18  ;;  %v420_v24 = vpack.c.bf16 %v286_v21, %v286_v21  ;;  %v268_v27 = vmul.f32 0.2, %v204_v23 }
  0xf8   :  { %372 = vst.msk [vmem:[%s666_s3 + $0x30] sm:$0xf] %vm359_vm2, %v425_v20  ;;  %v294_v26 = vsel %vm262_vm14, %v244_v2, %v278_v22  ;;  %vm260_vm0 = vcmp.ge.f32.partialorder %v236_v25, 0.0  ;;  %v276_v29 = vmul.f32 0.2, %v236_v25 }
  0xf9   :  { %367 = vst.msk [vmem:[%s666_s3 + $0x1c] sm:$0xf] %vm359_vm2, %v420_v24  ;;  %v428_v28 = vpack.c.bf16 %v294_v26, %v294_v26  ;;  %v284_v30 = vsel %vm252_vm15, %v204_v23, %v268_v27 }
  0xfa   :  { %v418_v16 = vpack.c.bf16 %v284_v30, %v284_v30  ;;  %v292_v31 = vsel %vm260_vm0, %v236_v25, %v276_v29 }
  0xfb   :  { %375 = vst.msk [vmem:[%s666_s3 + $0x3c] sm:$0xf] %vm359_vm2, %v428_v28  ;;  %v426_v32 = vpack.c.bf16 %v292_v31, %v292_v31 }
  0xfc   :  { %365 = vst.msk [vmem:[%s666_s3 + $0x14] sm:$0xf] %vm359_vm2, %v418_v16 }
  0xfd   :  { %373 = vst.msk [vmem:[%s666_s3 + $0x34] sm:$0xf] %vm359_vm2, %v426_v32 }

// kernel: fc_discriminator_pallas.7
= control target key start
LH: loop header
LB: loop body
LE: loop exit
PB: predicated region body
PF: predicated region fallthrough
CT: control target
= control target key end

     0   :  { %vm251_vm2 = vcmask 257024   ;;  %s454_s1 = inlined_call_operand.vmem [shape: bf16[256,32], index: 1, kind: input, shape index: {}]   ;;  %s455_s0 = inlined_call_operand.vmem [shape: bf16[32,256], index: 0, kind: input, shape index: {}]   ;;  %s456_s2 = inlined_call_operand.vmem [shape: f32[1,32], index: 2, kind: input, shape index: {}]   ;;  %s457_s3 = inlined_call_operand.vmem [shape: bf16[32,32], index: 3, kind: output, shape index: {}]  }
   0x1   :  { %v333_v0 = vld [vmem:[%s454_s1 + $0x78] sm:$0xff]   ;;  %v335_v2 = vld [vmem:[%s454_s1 + $0x70] sm:$0xff]   ;;  %v337_v4 = vld [vmem:[%s454_s1 + $0x68] sm:$0xff]  }
   0x2   :  { %v334_v1 = vld [vmem:[%s454_s1 + $0x38] sm:$0xff]   ;;  %289 = vmatprep.subr.bf16.mxu0 %v333_v0  ;;  %317 = vmatprep.subr.bf16.mxu1 %v333_v0  ;;  %v336_v3 = vld [vmem:[%s454_s1 + $0x30] sm:$0xff]   ;;  %v338_v5 = vld [vmem:[%s454_s1 + $0x28] sm:$0xff]  }
   0x3   :  { %290 = vmatpush3.bf16.msra.mxu0 %v334_v1  ;;  %325 = vmatpush3.bf16.msra.mxu1 %v334_v1  ;;  %v339_v6 = vld [vmem:[%s454_s1 + $0x60] sm:$0xff]   ;;  %v341_v8 = vld [vmem:[%s454_s1 + $0x58] sm:$0xff]   ;;  %v343_v10 = vld [vmem:[%s454_s1 + $0x50] sm:$0xff]  }
   0x4   :  { %291 = vmatprep.subr.bf16.mxu0 %v335_v2  ;;  %318 = vmatprep.subr.bf16.mxu1 %v335_v2  ;;  %v340_v7 = vld [vmem:[%s454_s1 + $0x20] sm:$0xff]   ;;  %v342_v9 = vld [vmem:[%s454_s1 + $0x18] sm:$0xff]   ;;  %v344_v13 = vld [vmem:[%s454_s1 + $0x10] sm:$0xff]  }
   0x5   :  { %v351_v11 = vld [vmem:[%s455_s0 + $0x4] ss:$8 sps:$4 sm:$0xff]   ;;  %v354_v12 = vld [vmem:[%s455_s0 + $0x14] ss:$8 sps:$4 sm:$0xff]   ;;  %v349_v18 = vld [vmem:[%s455_s0] ss:$8 sps:$4 sm:$0xff]  }
   0x6   :  { %v345_v14 = vld [vmem:[%s454_s1 + $0x48] sm:$0xff]   ;;  %206 = vmatprep.mubr.bf16.mxu0 %v351_v11  ;;  %214 = vmatprep.mubr.bf16.mxu1 %v354_v12  ;;  %v347_v16 = vld [vmem:[%s454_s1 + $0x40] sm:$0xff]   ;;  %v352_v19 = vld [vmem:[%s455_s0 + $0x10] ss:$8 sps:$4 sm:$0xff]  }
   0x7   :  { %292 = vmatpush3.bf16.msra.mxu0 %v336_v3  ;;  %326 = vmatpush3.bf16.msra.mxu1 %v336_v3  ;;  %v346_v15 = vld [vmem:[%s454_s1 + $0x8] sm:$0xff]   ;;  %v348_v17 = vld [vmem:[%s454_s1] sm:$0xff]  }
   0x8   :  { %293 = vmatprep.subr.bf16.mxu0 %v337_v4  ;;  %319 = vmatprep.subr.bf16.mxu1 %v337_v4  ;;  %v260_v22 = vld [vmem:[%s456_s2] ss:$0 sm:$0xff] }
   0xb   :  { %294 = vmatpush3.bf16.msra.mxu0 %v338_v5  ;;  %327 = vmatpush3.bf16.msra.mxu1 %v338_v5 }
   0xc   :  { %295 = vmatprep.subr.bf16.mxu0 %v339_v6  ;;  %320 = vmatprep.subr.bf16.mxu1 %v339_v6 }
   0xf   :  { %296 = vmatpush3.bf16.msra.mxu0 %v340_v7  ;;  %328 = vmatpush3.bf16.msra.mxu1 %v340_v7 }
  0x10   :  { %297 = vmatprep.subr.bf16.mxu0 %v341_v8  ;;  %321 = vmatprep.subr.bf16.mxu1 %v341_v8 }
  0x13   :  { %298 = vmatpush3.bf16.msra.mxu0 %v342_v9  ;;  %329 = vmatpush3.bf16.msra.mxu1 %v342_v9 }
  0x14   :  { %299 = vmatprep.subr.bf16.mxu0 %v343_v10  ;;  %322 = vmatprep.subr.bf16.mxu1 %v343_v10 }
  0x17   :  { %300 = vmatpush3.bf16.msra.mxu0 %v344_v13  ;;  %330 = vmatpush3.bf16.msra.mxu1 %v344_v13 }
  0x18   :  { %301 = vmatprep.subr.bf16.mxu0 %v345_v14  ;;  %323 = vmatprep.subr.bf16.mxu1 %v345_v14 }
  0x1b   :  { %302 = vmatpush3.bf16.msra.mxu0 %v346_v15  ;;  %331 = vmatpush3.bf16.msra.mxu1 %v346_v15 }
  0x1c   :  { %303 = vmatprep.subr.bf16.mxu0 %v347_v16  ;;  %324 = vmatprep.subr.bf16.mxu1 %v347_v16 }
  0x1f   :  { %304 = vmatpush3.bf16.msra.mxu0 %v348_v17  ;;  %332 = vmatpush3.bf16.msra.mxu1 %v348_v17 }
  0x22   :  { %207 = vmatmul.mubr.bf16.vlgmr.msra.gmra.mxu0 %v349_v18  ;;  %215 = vmatmul.mubr.bf16.vlgmr.msra.gmra.mxu1 %v352_v19 }
  0xe2   :  { %v305_v20 = vpop.f32.mrf.mxu0  ;;  %v311_v21 = vpop.f32.mrf.mxu1 }
  0xe4   :  { %v306_v23 = vpop.f32.mrf.mxu0  ;;  %v312_v24 = vpop.f32.mrf.mxu1 }
  0xe5   :  { %v307_v25 = vadd.f32 %v306_v23, %v305_v20  ;;  %v313_v26 = vadd.f32 %v312_v24, %v311_v21 }
  0xe6   :  { %v308_v27 = vpop.f32.mrf.mxu0  ;;  %v314_v28 = vpop.f32.mrf.mxu1 }
  0xe7   :  { %v209_v29 = vadd.f32 %v307_v25, %v260_v22  ;;  %v217_v30 = vadd.f32 %v313_v26, %v260_v22 }
  0xe8   :  { %v309_v31 = vpop.f32.mrf.mxu0  ;;  %v315_v32 = vpop.f32.mrf.mxu1 }
  0xe9   :  { %vm223_vm0 = vcmp.ge.f32.partialorder %v209_v29, 0.0  ;;  %v227_v33 = vmul.f32 0.2, %v209_v29  ;;  %vm225_vm1 = vcmp.ge.f32.partialorder %v217_v30, 0.0  ;;  %v229_v34 = vmul.f32 0.2, %v217_v30 }
  0xea   :  { %v310_v35 = vadd.f32 %v309_v31, %v308_v27  ;;  %v316_v36 = vadd.f32 %v315_v32, %v314_v28 }
  0xeb   :  { %v231_v37 = vsel %vm223_vm0, %v209_v29, %v227_v33  ;;  %v233_v38 = vsel %vm225_vm1, %v217_v30, %v229_v34 }
  0xec   :  { %v285_v39 = vpack.c.bf16 %v231_v37, %v231_v37  ;;  %v287_v40 = vpack.c.bf16 %v233_v38, %v233_v38  ;;  %v212_v41 = vadd.f32 %v310_v35, %v260_v22  ;;  %v220_v42 = vadd.f32 %v316_v36, %v260_v22 }
  0xee   :  { %252 = vst.msk [vmem:[%s457_s3] sm:$0xf] %vm251_vm2, %v285_v39  ;;  %254 = vst.msk [vmem:[%s457_s3 + $0x8] sm:$0xf] %vm251_vm2, %v287_v40  ;;  %vm224_vm3 = vcmp.ge.f32.partialorder %v212_v41, 0.0  ;;  %vm226_vm4 = vcmp.ge.f32.partialorder %v220_v42, 0.0 }
  0xef   :  { %v228_v43 = vmul.f32 0.2, %v212_v41  ;;  %v230_v44 = vmul.f32 0.2, %v220_v42 }
  0xf1   :  { %v232_v45 = vsel %vm224_vm3, %v212_v41, %v228_v43  ;;  %v234_v46 = vsel %vm226_vm4, %v220_v42, %v230_v44 }
  0xf2   :  { %v286_v47 = vpack.c.bf16 %v232_v45, %v232_v45  ;;  %v288_v48 = vpack.c.bf16 %v234_v46, %v234_v46 }
  0xf4   :  { %253 = vst.msk [vmem:[%s457_s3 + $0x4] sm:$0xf] %vm251_vm2, %v286_v47  ;;  %255 = vst.msk [vmem:[%s457_s3 + $0xc] sm:$0xf] %vm251_vm2, %v288_v48 }

// kernel: fc_discriminator_pallas.8
= control target key start
LH: loop header
LB: loop body
LE: loop exit
PB: predicated region body
PF: predicated region fallthrough
CT: control target
= control target key end

     0   :  { %vm378_vm1 = vcmask 519168   ;;  %s629_s1 = inlined_call_operand.vmem [shape: bf16[512,64], index: 1, kind: input, shape index: {}]   ;;  %s630_s0 = inlined_call_operand.vmem [shape: bf16[8,512], index: 0, kind: input, shape index: {}]   ;;  %s631_s2 = inlined_call_operand.vmem [shape: f32[1,64], index: 2, kind: input, shape index: {}]   ;;  %s632_s3 = inlined_call_operand.vmem [shape: bf16[8,64], index: 3, kind: output, shape index: {}]  }
   0x1   :  { %v465_v0 = vld [vmem:[%s629_s1 + $0x78] sm:$0xff]   ;;  %v469_v4 = vld [vmem:[%s629_s1 + $0x70] sm:$0xff]   ;;  %v473_v8 = vld [vmem:[%s629_s1 + $0x68] sm:$0xff]  }
   0x2   :  { %v466_v1 = vld [vmem:[%s629_s1 + $0xf8] sm:$0xff]   ;;  %421 = vmatprep.subr.bf16.mxu0 %v465_v0  ;;  %v470_v5 = vld [vmem:[%s629_s1 + $0xf0] sm:$0xff]   ;;  %v474_v9 = vld [vmem:[%s629_s1 + $0xe8] sm:$0xff]  }
   0x3   :  { %v467_v2 = vld [vmem:[%s629_s1 + $0x38] sm:$0xff]   ;;  %443 = vmatprep.subr.bf16.mxu1 %v466_v1  ;;  %v471_v6 = vld [vmem:[%s629_s1 + $0x30] sm:$0xff]   ;;  %v475_v10 = vld [vmem:[%s629_s1 + $0x28] sm:$0xff]  }
   0x4   :  { %v468_v3 = vld [vmem:[%s629_s1 + $0xb8] sm:$0xff]   ;;  %422 = vmatpush3.bf16.msra.mxu0 %v467_v2  ;;  %v472_v7 = vld [vmem:[%s629_s1 + $0xb0] sm:$0xff]   ;;  %v476_v11 = vld [vmem:[%s629_s1 + $0xa8] sm:$0xff]  }
   0x5   :  { %444 = vmatpush3.bf16.msra.mxu1 %v468_v3  ;;  %423 = vmatprep.subr.bf16.mxu0 %v469_v4  ;;  %v477_v12 = vld [vmem:[%s629_s1 + $0x60] sm:$0xff]   ;;  %v481_v16 = vld [vmem:[%s629_s1 + $0x58] sm:$0xff]   ;;  %v485_v20 = vld [vmem:[%s629_s1 + $0x50] sm:$0xff]  }
   0x6   :  { %445 = vmatprep.subr.bf16.mxu1 %v470_v5  ;;  %v478_v13 = vld [vmem:[%s629_s1 + $0xe0] sm:$0xff]   ;;  %v482_v17 = vld [vmem:[%s629_s1 + $0xd8] sm:$0xff]   ;;  %v486_v21 = vld [vmem:[%s629_s1 + $0xd0] sm:$0xff]  }
   0x7   :  { %v479_v14 = vld [vmem:[%s629_s1 + $0x20] sm:$0xff]   ;;  %v483_v18 = vld [vmem:[%s629_s1 + $0x18] sm:$0xff]   ;;  %v487_v22 = vld [vmem:[%s629_s1 + $0x10] sm:$0xff]  }
   0x8   :  { %424 = vmatpush3.bf16.msra.mxu0 %v471_v6  ;;  %v480_v15 = vld [vmem:[%s629_s1 + $0xa0] sm:$0xff]   ;;  %v484_v19 = vld [vmem:[%s629_s1 + $0x98] sm:$0xff]   ;;  %v488_v23 = vld [vmem:[%s629_s1 + $0x90] sm:$0xff]  }
   0x9   :  { %446 = vmatpush3.bf16.msra.mxu1 %v472_v7  ;;  %425 = vmatprep.subr.bf16.mxu0 %v473_v8  ;;  %v489_v24 = vld [vmem:[%s629_s1 + $0x48] sm:$0xff]   ;;  %v493_v28 = vld [vmem:[%s629_s1 + $0x40] sm:$0xff]  }
   0xa   :  { %447 = vmatprep.subr.bf16.mxu1 %v474_v9  ;;  %v490_v25 = vld [vmem:[%s629_s1 + $0xc8] sm:$0xff]   ;;  %v494_v29 = vld [vmem:[%s629_s1 + $0xc0] sm:$0xff]  }
   0xb   :  { %v491_v26 = vld [vmem:[%s629_s1 + $0x8] sm:$0xff]   ;;  %v495_v30 = vld [vmem:[%s629_s1] sm:$0xff]  }
   0xc   :  { %426 = vmatpush3.bf16.msra.mxu0 %v475_v10  ;;  %v492_v27 = vld [vmem:[%s629_s1 + $0x88] sm:$0xff]   ;;  %v496_v31 = vld [vmem:[%s629_s1 + $0x80] sm:$0xff]  }
   0xd   :  { %448 = vmatpush3.bf16.msra.mxu1 %v476_v11  ;;  %427 = vmatprep.subr.bf16.mxu0 %v477_v12  ;;  %v15_v32 = vld [vmem:[%s630_s0] sm:$0xff]  ;;  %v16_v33 = vld [vmem:[%s630_s0 + $0x8] sm:$0xff] }
   0xe   :  { %449 = vmatprep.subr.bf16.mxu1 %v478_v13  ;;  %v385_v34 = vcombine.low %v15_v32, %v15_v32  ;;  %v386_v35 = vcombine.high %v15_v32, %v15_v32  ;;  %v387_v36 = vcombine.low %v16_v33, %v16_v33  ;;  %v388_v37 = vcombine.high %v16_v33, %v16_v33  ;;  %v384_v40 = vld [vmem:[%s631_s2] ss:$0 sm:$0xff] }
  0x10   :  { %428 = vmatpush3.bf16.msra.mxu0 %v479_v14  ;;  %326 = vmatprep.mubr.bf16.mxu0 %v386_v35 }
  0x11   :  { %450 = vmatpush3.bf16.msra.mxu1 %v480_v15  ;;  %429 = vmatprep.subr.bf16.mxu0 %v481_v16 }
  0x12   :  { %451 = vmatprep.subr.bf16.mxu1 %v482_v17  ;;  %366 = vmatprep.mubr.bf16.mxu1 %v388_v37 }
  0x14   :  { %430 = vmatpush3.bf16.msra.mxu0 %v483_v18 }
  0x15   :  { %452 = vmatpush3.bf16.msra.mxu1 %v484_v19  ;;  %431 = vmatprep.subr.bf16.mxu0 %v485_v20 }
  0x16   :  { %453 = vmatprep.subr.bf16.mxu1 %v486_v21 }
  0x18   :  { %432 = vmatpush3.bf16.msra.mxu0 %v487_v22 }
  0x19   :  { %454 = vmatpush3.bf16.msra.mxu1 %v488_v23  ;;  %433 = vmatprep.subr.bf16.mxu0 %v489_v24 }
  0x1a   :  { %455 = vmatprep.subr.bf16.mxu1 %v490_v25 }
  0x1c   :  { %434 = vmatpush3.bf16.msra.mxu0 %v491_v26 }
  0x1d   :  { %456 = vmatpush3.bf16.msra.mxu1 %v492_v27  ;;  %435 = vmatprep.subr.bf16.mxu0 %v493_v28 }
  0x1e   :  { %457 = vmatprep.subr.bf16.mxu1 %v494_v29 }
  0x20   :  { %436 = vmatpush3.bf16.msra.mxu0 %v495_v30 }
  0x21   :  { %458 = vmatpush3.bf16.msra.mxu1 %v496_v31 }
  0x23   :  { %327 = vmatmul.mubr.bf16.vlgmr.msra.gmra.mxu0 %v385_v34 }
  0x24   :  { %367 = vmatmul.mubr.bf16.vlgmr.msra.gmra.mxu1 %v387_v36 }
  0xe3   :  { %v437_v38 = vpop.f32.mrf.mxu0 }
  0xe4   :  { %v459_v39 = vpop.f32.mrf.mxu1 }
  0xe5   :  { %v438_v41 = vpop.f32.mrf.mxu0 }
  0xe6   :  { %v460_v42 = vpop.f32.mrf.mxu1  ;;  %v439_v43 = vadd.f32 %v438_v41, %v437_v38 }
  0xe7   :  { %v440_v44 = vpop.f32.mrf.mxu0  ;;  %v461_v47 = vadd.f32 %v460_v42, %v459_v39 }
  0xe8   :  { %v462_v45 = vpop.f32.mrf.mxu1  ;;  %v329_v46 = vadd.f32 %v439_v43, %v384_v40 }
  0xe9   :  { %v441_v48 = vpop.f32.mrf.mxu0 }
  0xea   :  { %v463_v49 = vpop.f32.mrf.mxu1  ;;  %v369_v50 = vadd.f32 %v461_v47, %v329_v46 }
  0xec   :  { %vm374_vm0 = vcmp.ge.f32.partialorder %v369_v50, 0.0  ;;  %v375_v51 = vmul.f32 0.2, %v369_v50 }
  0xee   :  { %v376_v52 = vsel %vm374_vm0, %v369_v50, %v375_v51 }
  0xef   :  { %v377_v53 = vpack.c.bf16 %v376_v52, %v376_v52 }
  0xf1   :  { %379 = vst.msk [vmem:[%s632_s3] sm:$0xf] %vm378_vm1, %v377_v53 }

// kernel: fc_discriminator_pallas.9
= control target key start
LH: loop header
LB: loop body
LE: loop exit
PB: predicated region body
PF: predicated region fallthrough
CT: control target
= control target key end

     0   :  { %vm728_vm0 = vcmask 7168   ;;  %s1197_s1 = inlined_call_operand.vmem [shape: bf16[1024,1], index: 1, kind: input, shape index: {}]   ;;  %s1198_s0 = inlined_call_operand.vmem [shape: bf16[8,1024], index: 0, kind: input, shape index: {}]   ;;  %s1199_s2 = inlined_call_operand.<no memory space> [shape: f32[1,1], index: 2, kind: input, shape index: {}]   ;;  %s1200_s3 = inlined_call_operand.vmem [shape: f32[8,1], index: 3, kind: output, shape index: {}]  }
   0x1   :  { %v895_v0 = vld [vmem:[%s1197_s1 + $0x78] sm:$0xff]   ;;  %v899_v4 = vld [vmem:[%s1197_s1 + $0x70] sm:$0xff]   ;;  %v903_v8 = vld [vmem:[%s1197_s1 + $0x68] sm:$0xff]  }
   0x2   :  { %v896_v1 = vld [vmem:[%s1197_s1 + $0xf8] sm:$0xff]   ;;  %807 = vmatprep.subr.bf16.mxu0 %v895_v0  ;;  %v900_v5 = vld [vmem:[%s1197_s1 + $0xf0] sm:$0xff]   ;;  %v904_v9 = vld [vmem:[%s1197_s1 + $0xe8] sm:$0xff]  }
   0x3   :  { %v897_v2 = vld [vmem:[%s1197_s1 + $0x38] sm:$0xff]   ;;  %829 = vmatprep.subr.bf16.mxu1 %v896_v1  ;;  %v901_v6 = vld [vmem:[%s1197_s1 + $0x30] sm:$0xff]   ;;  %v905_v10 = vld [vmem:[%s1197_s1 + $0x28] sm:$0xff]  }
   0x4   :  { %v898_v3 = vld [vmem:[%s1197_s1 + $0xb8] sm:$0xff]   ;;  %808 = vmatpush3.bf16.msra.mxu0 %v897_v2  ;;  %v902_v7 = vld [vmem:[%s1197_s1 + $0xb0] sm:$0xff]   ;;  %v906_v11 = vld [vmem:[%s1197_s1 + $0xa8] sm:$0xff]  }
   0x5   :  { %830 = vmatpush3.bf16.msra.mxu1 %v898_v3  ;;  %809 = vmatprep.subr.bf16.mxu0 %v899_v4  ;;  %v907_v12 = vld [vmem:[%s1197_s1 + $0x60] sm:$0xff]   ;;  %v911_v16 = vld [vmem:[%s1197_s1 + $0x58] sm:$0xff]   ;;  %v915_v20 = vld [vmem:[%s1197_s1 + $0x50] sm:$0xff]  }
   0x6   :  { %831 = vmatprep.subr.bf16.mxu1 %v900_v5  ;;  %v908_v13 = vld [vmem:[%s1197_s1 + $0xe0] sm:$0xff]   ;;  %v912_v17 = vld [vmem:[%s1197_s1 + $0xd8] sm:$0xff]   ;;  %v916_v21 = vld [vmem:[%s1197_s1 + $0xd0] sm:$0xff]  }
   0x7   :  { %v909_v14 = vld [vmem:[%s1197_s1 + $0x20] sm:$0xff]   ;;  %v913_v18 = vld [vmem:[%s1197_s1 + $0x18] sm:$0xff]   ;;  %v917_v22 = vld [vmem:[%s1197_s1 + $0x10] sm:$0xff]  }
   0x8   :  { %810 = vmatpush3.bf16.msra.mxu0 %v901_v6  ;;  %v910_v15 = vld [vmem:[%s1197_s1 + $0xa0] sm:$0xff]   ;;  %v914_v19 = vld [vmem:[%s1197_s1 + $0x98] sm:$0xff]   ;;  %v918_v23 = vld [vmem:[%s1197_s1 + $0x90] sm:$0xff]  }
   0x9   :  { %832 = vmatpush3.bf16.msra.mxu1 %v902_v7  ;;  %811 = vmatprep.subr.bf16.mxu0 %v903_v8  ;;  %v919_v24 = vld [vmem:[%s1197_s1 + $0x48] sm:$0xff]   ;;  %v923_v28 = vld [vmem:[%s1197_s1 + $0x40] sm:$0xff]   ;;  %v931_v38 = vld [vmem:[%s1197_s1 + $0x178] sm:$0xff]  }
   0xa   :  { %833 = vmatprep.subr.bf16.mxu1 %v904_v9  ;;  %v920_v25 = vld [vmem:[%s1197_s1 + $0xc8] sm:$0xff]   ;;  %v924_v29 = vld [vmem:[%s1197_s1 + $0xc0] sm:$0xff]   ;;  %v932_v39 = vld [vmem:[%s1197_s1 + $0x1f8] sm:$0xff]  }
   0xb   :  { %v921_v26 = vld [vmem:[%s1197_s1 + $0x8] sm:$0xff]   ;;  %v925_v30 = vld [vmem:[%s1197_s1] sm:$0xff]   ;;  %v933_v40 = vld [vmem:[%s1197_s1 + $0x138] sm:$0xff]  }
   0xc   :  { %812 = vmatpush3.bf16.msra.mxu0 %v905_v10  ;;  %v922_v27 = vld [vmem:[%s1197_s1 + $0x88] sm:$0xff]   ;;  %v926_v31 = vld [vmem:[%s1197_s1 + $0x80] sm:$0xff]   ;;  %v934_v41 = vld [vmem:[%s1197_s1 + $0x1b8] sm:$0xff]  }
   0xd   :  { %834 = vmatpush3.bf16.msra.mxu1 %v906_v11  ;;  %813 = vmatprep.subr.bf16.mxu0 %v907_v12  ;;  %v17_v32 = vld [vmem:[%s1198_s0] sm:$0xff]  ;;  %v18_v33 = vld [vmem:[%s1198_s0 + $0x8] sm:$0xff]  ;;  %v935_v42 = vld [vmem:[%s1197_s1 + $0x170] sm:$0xff]   ;;  %v8_v12 = vstv %s1199_s2 }
   0xe   :  { %835 = vmatprep.subr.bf16.mxu1 %v908_v13  ;;  %v735_v34 = vcombine.low %v17_v32, %v17_v32  ;;  %v736_v35 = vcombine.high %v17_v32, %v17_v32  ;;  %v737_v36 = vcombine.low %v18_v33, %v18_v33  ;;  %v738_v37 = vcombine.high %v18_v33, %v18_v33  ;;  %v936_v43 = vld [vmem:[%s1197_s1 + $0x1f0] sm:$0xff]   ;;  %v939_v46 = vld [vmem:[%s1197_s1 + $0x168] sm:$0xff]   ;;  %v943_v50 = vld [vmem:[%s1197_s1 + $0x160] sm:$0xff]  }
   0xf   :  { %v937_v44 = vld [vmem:[%s1197_s1 + $0x130] sm:$0xff]   ;;  %v940_v47 = vld [vmem:[%s1197_s1 + $0x1e8] sm:$0xff]   ;;  %v944_v51 = vld [vmem:[%s1197_s1 + $0x1e0] sm:$0xff]   ;;  %9 = vst [vmem:[#allocation2] sm:$0x1] %v8_v12 }
  0x10   :  { %814 = vmatpush3.bf16.msra.mxu0 %v909_v14  ;;  %600 = vmatprep.mubr.bf16.mxu0 %v736_v35  ;;  %v938_v45 = vld [vmem:[%s1197_s1 + $0x1b0] sm:$0xff]   ;;  %v941_v48 = vld [vmem:[%s1197_s1 + $0x128] sm:$0xff]   ;;  %v945_v52 = vld [vmem:[%s1197_s1 + $0x120] sm:$0xff]  }
  0x11   :  { %836 = vmatpush3.bf16.msra.mxu1 %v910_v15  ;;  %815 = vmatprep.subr.bf16.mxu0 %v911_v16  ;;  %v942_v49 = vld [vmem:[%s1197_s1 + $0x1a8] sm:$0xff]   ;;  %v946_v53 = vld [vmem:[%s1197_s1 + $0x1a0] sm:$0xff]   ;;  %v947_v54 = vld [vmem:[%s1197_s1 + $0x158] sm:$0xff]  }
  0x12   :  { %837 = vmatprep.subr.bf16.mxu1 %v912_v17  ;;  %640 = vmatprep.mubr.bf16.mxu1 %v738_v37  ;;  %v948_v55 = vld [vmem:[%s1197_s1 + $0x1d8] sm:$0xff]   ;;  %v951_v58 = vld [vmem:[%s1197_s1 + $0x150] sm:$0xff]   ;;  %v955_v62 = vld [vmem:[%s1197_s1 + $0x148] sm:$0xff]  }
  0x13   :  { %v949_v56 = vld [vmem:[%s1197_s1 + $0x118] sm:$0xff]   ;;  %v952_v59 = vld [vmem:[%s1197_s1 + $0x1d0] sm:$0xff]   ;;  %v956_v63 = vld [vmem:[%s1197_s1 + $0x1c8] sm:$0xff]  }
  0x14   :  { %816 = vmatpush3.bf16.msra.mxu0 %v913_v18  ;;  %v950_v57 = vld [vmem:[%s1197_s1 + $0x198] sm:$0xff]   ;;  %v953_v60 = vld [vmem:[%s1197_s1 + $0x110] sm:$0xff]   ;;  %v957_v0 = vld [vmem:[%s1197_s1 + $0x108] sm:$0xff]  }
  0x15   :  { %838 = vmatpush3.bf16.msra.mxu1 %v914_v19  ;;  %817 = vmatprep.subr.bf16.mxu0 %v915_v20  ;;  %v954_v61 = vld [vmem:[%s1197_s1 + $0x190] sm:$0xff]   ;;  %v958_v1 = vld [vmem:[%s1197_s1 + $0x188] sm:$0xff]   ;;  %v959_v2 = vld [vmem:[%s1197_s1 + $0x140] sm:$0xff]  }
  0x16   :  { %839 = vmatprep.subr.bf16.mxu1 %v916_v21  ;;  %v960_v3 = vld [vmem:[%s1197_s1 + $0x1c0] sm:$0xff]   ;;  %v19_v6 = vld [vmem:[%s1198_s0 + $0x10] sm:$0xff]  ;;  %v20_v9 = vld [vmem:[%s1198_s0 + $0x18] sm:$0xff] }
  0x17   :  { %v961_v4 = vld [vmem:[%s1197_s1 + $0x100] sm:$0xff]   ;;  %v739_v7 = vcombine.low %v19_v6, %v19_v6  ;;  %v740_v8 = vcombine.high %v19_v6, %v19_v6  ;;  %v741_v10 = vcombine.low %v20_v9, %v20_v9  ;;  %v742_v11 = vcombine.high %v20_v9, %v20_v9 }
  0x18   :  { %818 = vmatpush3.bf16.msra.mxu0 %v917_v22  ;;  %v962_v5 = vld [vmem:[%s1197_s1 + $0x180] sm:$0xff]  }
  0x19   :  { %840 = vmatpush3.bf16.msra.mxu1 %v918_v23  ;;  %819 = vmatprep.subr.bf16.mxu0 %v919_v24  ;;  %v734_v22 = vld [vmem:[#allocation2] ss:$0 sm:$0xff] }
  0x1a   :  { %841 = vmatprep.subr.bf16.mxu1 %v920_v25 }
  0x1c   :  { %820 = vmatpush3.bf16.msra.mxu0 %v921_v26 }
  0x1d   :  { %842 = vmatpush3.bf16.msra.mxu1 %v922_v27  ;;  %821 = vmatprep.subr.bf16.mxu0 %v923_v28 }
  0x1e   :  { %843 = vmatprep.subr.bf16.mxu1 %v924_v29 }
  0x20   :  { %822 = vmatpush3.bf16.msra.mxu0 %v925_v30 }
  0x21   :  { %844 = vmatpush3.bf16.msra.mxu1 %v926_v31  ;;  %851 = vmatprep.subr.bf16.mxu0 %v931_v38 }
  0x22   :  { %873 = vmatprep.subr.bf16.mxu1 %v932_v39 }
  0x23   :  { %601 = vmatmul.mubr.bf16.vlgmr.msra.gmra.mxu0 %v735_v34 }
  0x24   :  { %641 = vmatmul.mubr.bf16.vlgmr.msra.gmra.mxu1 %v737_v36  ;;  %852 = vmatpush3.bf16.msra.mxu0 %v933_v40 }
  0x25   :  { %874 = vmatpush3.bf16.msra.mxu1 %v934_v41  ;;  %853 = vmatprep.subr.bf16.mxu0 %v935_v42 }
  0x26   :  { %875 = vmatprep.subr.bf16.mxu1 %v936_v43  ;;  %680 = vmatprep.mubr.bf16.mxu0 %v740_v8 }
  0x27   :  { %720 = vmatprep.mubr.bf16.mxu1 %v742_v11 }
  0x28   :  { %854 = vmatpush3.bf16.msra.mxu0 %v937_v44 }
  0x29   :  { %876 = vmatpush3.bf16.msra.mxu1 %v938_v45  ;;  %855 = vmatprep.subr.bf16.mxu0 %v939_v46 }
  0x2a   :  { %877 = vmatprep.subr.bf16.mxu1 %v940_v47 }
  0x2c   :  { %856 = vmatpush3.bf16.msra.mxu0 %v941_v48 }
  0x2d   :  { %878 = vmatpush3.bf16.msra.mxu1 %v942_v49  ;;  %857 = vmatprep.subr.bf16.mxu0 %v943_v50 }
  0x2e   :  { %879 = vmatprep.subr.bf16.mxu1 %v944_v51 }
  0x30   :  { %858 = vmatpush3.bf16.msra.mxu0 %v945_v52 }
  0x31   :  { %880 = vmatpush3.bf16.msra.mxu1 %v946_v53  ;;  %859 = vmatprep.subr.bf16.mxu0 %v947_v54 }
  0x32   :  { %881 = vmatprep.subr.bf16.mxu1 %v948_v55 }
  0x34   :  { %860 = vmatpush3.bf16.msra.mxu0 %v949_v56 }
  0x35   :  { %882 = vmatpush3.bf16.msra.mxu1 %v950_v57  ;;  %861 = vmatprep.subr.bf16.mxu0 %v951_v58 }
  0x36   :  { %883 = vmatprep.subr.bf16.mxu1 %v952_v59 }
  0x38   :  { %862 = vmatpush3.bf16.msra.mxu0 %v953_v60 }
  0x39   :  { %884 = vmatpush3.bf16.msra.mxu1 %v954_v61  ;;  %863 = vmatprep.subr.bf16.mxu0 %v955_v62 }
  0x3a   :  { %885 = vmatprep.subr.bf16.mxu1 %v956_v63 }
  0x3c   :  { %864 = vmatpush3.bf16.msra.mxu0 %v957_v0 }
  0x3d   :  { %886 = vmatpush3.bf16.msra.mxu1 %v958_v1  ;;  %865 = vmatprep.subr.bf16.mxu0 %v959_v2 }
  0x3e   :  { %887 = vmatprep.subr.bf16.mxu1 %v960_v3 }
  0x40   :  { %866 = vmatpush3.bf16.msra.mxu0 %v961_v4 }
  0x41   :  { %888 = vmatpush3.bf16.msra.mxu1 %v962_v5 }
  0x43   :  { %681 = vmatmul.mubr.bf16.vlgmr.msra.gmra.mxu0 %v739_v7 }
  0x44   :  { %721 = vmatmul.mubr.bf16.vlgmr.msra.gmra.mxu1 %v741_v10 }
  0xe3   :  { %v823_v13 = vpop.f32.mrf.mxu0 }
  0xe4   :  { %v845_v14 = vpop.f32.mrf.mxu1 }
  0xe5   :  { %v824_v15 = vpop.f32.mrf.mxu0 }
  0xe6   :  { %v846_v16 = vpop.f32.mrf.mxu1  ;;  %v825_v21 = vadd.f32 %v824_v15, %v823_v13 }
  0xe7   :  { %v826_v17 = vpop.f32.mrf.mxu0  ;;  %v847_v24 = vadd.f32 %v846_v16, %v845_v14 }
  0xe8   :  { %v848_v18 = vpop.f32.mrf.mxu1  ;;  %v603_v23 = vadd.f32 %v825_v21, %v734_v22 }
  0xe9   :  { %v827_v19 = vpop.f32.mrf.mxu0 }
  0xea   :  { %v849_v20 = vpop.f32.mrf.mxu1  ;;  %v643_v29 = vadd.f32 %v847_v24, %v603_v23 }
 0x103   :  { %v867_v25 = vpop.f32.mrf.mxu0 }
 0x104   :  { %v889_v26 = vpop.f32.mrf.mxu1 }
 0x105   :  { %v868_v27 = vpop.f32.mrf.mxu0 }
 0x106   :  { %v890_v28 = vpop.f32.mrf.mxu1  ;;  %v869_v30 = vadd.f32 %v868_v27, %v867_v25 }
 0x107   :  { %v870_v31 = vpop.f32.mrf.mxu0  ;;  %v891_v34 = vadd.f32 %v890_v28, %v889_v26 }
 0x108   :  { %v892_v32 = vpop.f32.mrf.mxu1  ;;  %v683_v33 = vadd.f32 %v869_v30, %v643_v29 }
 0x109   :  { %v871_v35 = vpop.f32.mrf.mxu0 }
 0x10a   :  { %v893_v36 = vpop.f32.mrf.mxu1  ;;  %v723_v37 = vadd.f32 %v891_v34, %v683_v33 }
 0x10c   :  { %729 = vst.msk [vmem:[%s1200_s3] sm:$0xff] %vm728_vm0, %v723_v37 }

</bundles_post_ra>
